<compile_context>
chip_gen: v6e
topology: v6e:2x2x1
jax: 0.10.0
libtpu: 0.0.40
codegen_flags: <defaults>
</compile_context>

<pallas_src>
import math
import numpy as np
import jax
import jax.numpy as jnp
from jax import lax
from jax.experimental import pallas as pl
from jax.experimental.pallas import tpu as pltpu

EMB = 7        # embedding_len
PEMB = 6       # pembedding_len
FINAL = 10     # final_embedding
NLAYERS = 3
HID = EMB // 2
EPS = 1e-5
NEG = -1e30    # additive mask value for cross-batch attention scores
SLAB_W = 32    # lane width of the packed parameter slab (>= 3*EMB)


# ---------------------------------------------------------------------------
# Parameter slab layout: name -> (row_offset, rows, cols).  Every parameter
# block starts on an 8-row (sublane tile) boundary so all in-kernel reads are
# aligned.  Layout depends only on module constants, so it is a global.
# ---------------------------------------------------------------------------
def _build_layout():
    layout = {}
    cursor = 0

    def add(name, r, c):
        nonlocal cursor
        layout[name] = (cursor, r, c)
        cursor += -(-r // 8) * 8          # round block up to 8 rows

    for l in range(NLAYERS):
        # self-attention (kdim = vdim = EMB): fused q|k|v in-projection
        add(f'sa_w_in_{l}', EMB, 3 * EMB)
        add(f'sa_b_in_{l}', 1, 3 * EMB)
        add(f'sa_kb_{l}', 1, EMB)
        add(f'sa_vb_{l}', 1, EMB)
        add(f'sa_wo_{l}', EMB, EMB)
        add(f'sa_bo_{l}', 1, EMB)
        # cross-attention (kdim = vdim = PEMB): q separate, fused k|v
        add(f'ca_wq_{l}', EMB, EMB)
        add(f'ca_bq_{l}', 1, EMB)
        add(f'ca_wkv_{l}', PEMB, 2 * EMB)
        add(f'ca_bkv_{l}', 1, 2 * EMB)
        add(f'ca_kb_{l}', 1, EMB)
        add(f'ca_vb_{l}', 1, EMB)
        add(f'ca_wo_{l}', EMB, EMB)
        add(f'ca_bo_{l}', 1, EMB)
        # three LayerNorms per decoder layer
        for j in range(3):
            add(f'ln_g_{l}_{j}', 1, EMB)
            add(f'ln_b_{l}_{j}', 1, EMB)
        # noisy MLP (effective weights)
        add(f'mlp_w1_{l}', EMB, HID)
        add(f'mlp_b1_{l}', 1, HID)
        add(f'mlp_w2_{l}', HID, EMB)
        add(f'mlp_b2_{l}', 1, EMB)
    add('fin_w', EMB, FINAL)
    add('fin_b', 1, FINAL)
    return layout, cursor


LAYOUT, SLAB_ROWS = _build_layout()
assert 3 * EMB <= SLAB_W


def pack_params(params):
    """Pack the parameter dict into a single f32 (SLAB_ROWS, SLAB_W) slab."""
    slab = np.zeros((SLAB_ROWS, SLAB_W), np.float32)
    for name, (off, r, c) in LAYOUT.items():
        arr = np.asarray(params[name], np.float32)
        assert arr.shape == (r, c), (name, arr.shape, (r, c))
        slab[off:off + r, :c] = arr
    return jnp.asarray(slab)


def _block_bias(B, S, P):
    """Block-diagonal additive masks so flattened (B*S) attention stays per-batch."""
    bid_q = jnp.repeat(jnp.arange(B), S)
    bid_p = jnp.repeat(jnp.arange(B), P)
    sa = jnp.where(bid_q[:, None] == bid_q[None, :], 0.0, NEG).astype(jnp.float32)
    ca = jnp.where(bid_q[:, None] == bid_p[None, :], 0.0, NEG).astype(jnp.float32)
    return sa, ca


# ---------------------------------------------------------------------------
# Kernel math (flattened over batch*sequence rows).
# ---------------------------------------------------------------------------
def _layer_norm(v, g, b):
    mu = jnp.mean(v, axis=-1, keepdims=True)
    var = jnp.mean(jnp.square(v - mu), axis=-1, keepdims=True)
    return (v - mu) * lax.rsqrt(var + EPS) * g + b


def _attn_core(q, k, v, score_bias, kb, vb, wo, bo, recip):
    """Single-head scaled-dot attention with add_bias_kv token (projections done)."""
    scale = 1.0 / math.sqrt(float(EMB))
    s = lax.dot_general(q, k, (((1,), (1,)), ((), ())),
                        preferred_element_type=jnp.float32) * scale + score_bias
    s_b = jnp.sum(q * kb, axis=-1, keepdims=True) * scale       # vs appended bias_k token
    m = jnp.maximum(jnp.max(s, axis=-1, keepdims=True), s_b)
    e = jnp.exp(s - m)
    e_b = jnp.exp(s_b - m)
    denom = jnp.sum(e, axis=-1, keepdims=True) + e_b
    ctx = (jnp.dot(e, v, preferred_element_type=jnp.float32) + e_b * vb) * recip(denom)
    return jnp.dot(ctx, wo, preferred_element_type=jnp.float32) + bo


def decoder_kernel(x_ref, p_ref, sab_ref, cab_ref, slab_ref, x_out_ref, fin_out_ref):
    def get(name):
        off, r, c = LAYOUT[name]
        return slab_ref[off:off + r, :c]

    recip = lambda d: pl.reciprocal(d)          # exact reciprocal (EUP)

    x = x_ref[...]                              # (B*S, EMB)
    pem = p_ref[...]                            # (B*P, PEMB)
    sa_bias = sab_ref[...]                      # (B*S, B*S) additive mask
    ca_bias = cab_ref[...]                      # (B*S, B*P) additive mask

    for l in range(NLAYERS):
        # ---- self-attention (fused QKV projection) + residual + LN ----
        qkv = jnp.dot(x, get(f'sa_w_in_{l}'),
                      preferred_element_type=jnp.float32) + get(f'sa_b_in_{l}')
        h = _attn_core(qkv[:, :EMB], qkv[:, EMB:2 * EMB], qkv[:, 2 * EMB:],
                       sa_bias, get(f'sa_kb_{l}'), get(f'sa_vb_{l}'),
                       get(f'sa_wo_{l}'), get(f'sa_bo_{l}'), recip)
        x = _layer_norm(h + x, get(f'ln_g_{l}_0'), get(f'ln_b_{l}_0'))

        # ---- cross-attention (fused KV projection) + residual + LN ----
        q = jnp.dot(x, get(f'ca_wq_{l}'),
                    preferred_element_type=jnp.float32) + get(f'ca_bq_{l}')
        kv = jnp.dot(pem, get(f'ca_wkv_{l}'),
                     preferred_element_type=jnp.float32) + get(f'ca_bkv_{l}')
        h = _attn_core(q, kv[:, :EMB], kv[:, EMB:],
                       ca_bias, get(f'ca_kb_{l}'), get(f'ca_vb_{l}'),
                       get(f'ca_wo_{l}'), get(f'ca_bo_{l}'), recip)
        x = _layer_norm(h + x, get(f'ln_g_{l}_1'), get(f'ln_b_{l}_1'))

        # ---- noisy MLP (effective weights) + residual + LN ----
        h1 = jnp.maximum(jnp.dot(x, get(f'mlp_w1_{l}'),
                                 preferred_element_type=jnp.float32) + get(f'mlp_b1_{l}'), 0.0)
        h2 = jnp.maximum(jnp.dot(h1, get(f'mlp_w2_{l}'),
                                 preferred_element_type=jnp.float32) + get(f'mlp_b2_{l}'), 0.0)
        x = _layer_norm(h2 + x, get(f'ln_g_{l}_2'), get(f'ln_b_{l}_2'))

    x_out_ref[...] = x
    fin_out_ref[...] = jnp.dot(x, get('fin_w'),
                               preferred_element_type=jnp.float32) + get('fin_b')


def decoder_forward(x, pem, slab):
    B, S, _ = x.shape
    _, P, _ = pem.shape
    BS, BP = B * S, B * P
    xf = x.reshape(BS, EMB)
    pf = pem.reshape(BP, PEMB)
    sa_bias, ca_bias = _block_bias(B, S, P)

    x_out, fin = pl.pallas_call(
        decoder_kernel,
        out_shape=(jax.ShapeDtypeStruct((BS, EMB), jnp.float32),
                   jax.ShapeDtypeStruct((BS, FINAL), jnp.float32)),
        in_specs=[pl.BlockSpec(memory_space=pltpu.MemorySpace.VMEM)] * 5,
        out_specs=(pl.BlockSpec(memory_space=pltpu.MemorySpace.VMEM),
                   pl.BlockSpec(memory_space=pltpu.MemorySpace.VMEM)),
    )(xf, pf, sa_bias, ca_bias, slab)
    # PyTorch returns x as (B, S, EMB) and final_emb flattened to (B*S, FINAL)
    return x_out.reshape(B, S, EMB), fin


decoder_forward_jit = jax.jit(decoder_forward)


# ---------------------------------------------------------------------------
# Deterministic parameter construction (shapes from the module's __init__).
# Weights stored TRANSPOSED w.r.t. PyTorch nn.Linear: (in_features, out_features).
# ---------------------------------------------------------------------------
def init_params(key):
    keys = iter(jax.random.split(key, 512))

    def uni(shape, bound):
        return jax.random.uniform(next(keys), shape, jnp.float32, -bound, bound)

    def nrm(shape, std=0.1):
        return jax.random.normal(next(keys), shape, jnp.float32) * std

    def noisy_linear(in_f, out_f, std_init=0.5):
        """Effective (weight, bias) of NoisyLinear; weight returned as (in, out)."""
        mu_range = 1.0 / math.sqrt(in_f)
        w_mu = uni((out_f, in_f), mu_range)
        b_mu = uni((out_f,), mu_range)
        w_sigma = jnp.full((out_f, in_f), std_init / math.sqrt(in_f), jnp.float32)
        b_sigma = jnp.full((out_f,), std_init / math.sqrt(out_f), jnp.float32)

        def scale_noise(n):
            z = jax.random.normal(next(keys), (n,), jnp.float32)
            return jnp.sign(z) * jnp.sqrt(jnp.abs(z))

        e_in, e_out = scale_noise(in_f), scale_noise(out_f)
        w = w_mu + w_sigma * jnp.outer(e_out, e_in)       # (out, in)
        b = b_mu + b_sigma * e_out                        # (out,)
        return w.T, b.reshape(1, out_f)

    bound = 1.0 / math.sqrt(EMB)
    params = {}
    for l in range(NLAYERS):
        # self-attention: fused [Wq | Wk | Wv] of shape (EMB, 3*EMB)
        params[f'sa_w_in_{l}'] = uni((EMB, 3 * EMB), bound)
        params[f'sa_b_in_{l}'] = uni((1, 3 * EMB), bound)
        params[f'sa_kb_{l}'] = nrm((1, EMB))
        params[f'sa_vb_{l}'] = nrm((1, EMB))
        params[f'sa_wo_{l}'] = uni((EMB, EMB), bound)
        params[f'sa_bo_{l}'] = uni((1, EMB), bound)
        # cross-attention: Wq (EMB,EMB), fused [Wk | Wv] of shape (PEMB, 2*EMB)
        params[f'ca_wq_{l}'] = uni((EMB, EMB), bound)
        params[f'ca_bq_{l}'] = uni((1, EMB), bound)
        params[f'ca_wkv_{l}'] = uni((PEMB, 2 * EMB), bound)
        params[f'ca_bkv_{l}'] = uni((1, 2 * EMB), bound)
        params[f'ca_kb_{l}'] = nrm((1, EMB))
        params[f'ca_vb_{l}'] = nrm((1, EMB))
        params[f'ca_wo_{l}'] = uni((EMB, EMB), bound)
        params[f'ca_bo_{l}'] = uni((1, EMB), bound)
        # LayerNorm default init
        for j in range(3):
            params[f'ln_g_{l}_{j}'] = jnp.ones((1, EMB), jnp.float32)
            params[f'ln_b_{l}_{j}'] = jnp.zeros((1, EMB), jnp.float32)
        # noisy MLP effective weights
        params[f'mlp_w1_{l}'], params[f'mlp_b1_{l}'] = noisy_linear(EMB, HID)
        params[f'mlp_w2_{l}'], params[f'mlp_b2_{l}'] = noisy_linear(HID, EMB)
    params['fin_w'], params['fin_b'] = noisy_linear(EMB, FINAL)
    return params


# ---------------------------------------------------------------------------
# Independent pure-JAX reference: per-batch loop, explicit bias_k/v concatenation,
# jax.nn.softmax, sqrt/divide LayerNorm.  Validates the fused / masked kernel math.
# ---------------------------------------------------------------------------
def _ref_attention(q_in, kv_in, wq, bq, wk, bk, wv, bv, kb, vb, wo, bo):
    scale = 1.0 / math.sqrt(float(EMB))
    q = q_in @ wq + bq
    k = kv_in @ wk + bk
    v = kv_in @ wv + bv
    k_full = jnp.concatenate([k, kb], axis=0)          # append bias_k token
    v_full = jnp.concatenate([v, vb], axis=0)          # append bias_v token
    w = jax.nn.softmax((q @ k_full.T) * scale, axis=-1)
    return (w @ v_full) @ wo + bo


def _ref_layer_norm(v, g, b):
    mu = jnp.mean(v, axis=-1, keepdims=True)
    var = jnp.mean((v - mu) ** 2, axis=-1, keepdims=True)
    return (v - mu) / jnp.sqrt(var + EPS) * g + b


def reference_forward(x, pem, params):
    B = x.shape[0]
    xs, fins = [], []
    for bch in range(B):
        xb, pb = x[bch], pem[bch]
        for l in range(NLAYERS):
            w_in, b_in = params[f'sa_w_in_{l}'], params[f'sa_b_in_{l}']
            h = _ref_attention(xb, xb,
                               w_in[:, :EMB], b_in[:, :EMB],
                               w_in[:, EMB:2 * EMB], b_in[:, EMB:2 * EMB],
                               w_in[:, 2 * EMB:], b_in[:, 2 * EMB:],
                               params[f'sa_kb_{l}'], params[f'sa_vb_{l}'],
                               params[f'sa_wo_{l}'], params[f'sa_bo_{l}'])
            xb = _ref_layer_norm(h + xb, params[f'ln_g_{l}_0'], params[f'ln_b_{l}_0'])

            wkv, bkv = params[f'ca_wkv_{l}'], params[f'ca_bkv_{l}']
            h = _ref_attention(xb, pb,
                               params[f'ca_wq_{l}'], params[f'ca_bq_{l}'],
                               wkv[:, :EMB], bkv[:, :EMB],
                               wkv[:, EMB:], bkv[:, EMB:],
                               params[f'ca_kb_{l}'], params[f'ca_vb_{l}'],
                               params[f'ca_wo_{l}'], params[f'ca_bo_{l}'])
            xb = _ref_layer_norm(h + xb, params[f'ln_g_{l}_1'], params[f'ln_b_{l}_1'])

            h1 = jax.nn.relu(xb @ params[f'mlp_w1_{l}'] + params[f'mlp_b1_{l}'])
            h2 = jax.nn.relu(h1 @ params[f'mlp_w2_{l}'] + params[f'mlp_b2_{l}'])
            xb = _ref_layer_norm(h2 + xb, params[f'ln_g_{l}_2'], params[f'ln_b_{l}_2'])
        xs.append(xb)
        fins.append(xb @ params['fin_w'] + params['fin_b'])
    return jnp.stack(xs), jnp.concatenate(fins, axis=0)


if __name__ == "__main__":
    key = jax.random.PRNGKey(0)
    kx, kp, kparams = jax.random.split(key, 3)

    B, S, P = 2, 8, 5                       # batch, context_len, pcontext_len
    x = jax.random.normal(kx, (B, S, EMB), jnp.float32)
    platform_em = jax.random.normal(kp, (B, P, PEMB), jnp.float32)
    params = init_params(kparams)
    slab = pack_params(params)

    x_out, final_emb = decoder_forward_jit(x, platform_em, slab)
    jax.block_until_ready((x_out, final_emb))

    x_ref, fin_ref = reference_forward(x, platform_em, params)
    np.testing.assert_allclose(np.asarray(x_out), np.asarray(x_ref), rtol=1e-4, atol=1e-4)
    np.testing.assert_allclose(np.asarray(final_emb), np.asarray(fin_ref), rtol=1e-4, atol=1e-4)
    assert x_out.shape == (B, S, EMB) and final_emb.shape == (B * S, FINAL)
    print("KERNEL_OK")
</pallas_src>

<mosaic_0001>
module attributes {stable_mosaic.version = 11 : i64} {
  func.func @decoder_kernel(%arg0: memref<16x7xf32, #tpu.memory_space<vmem>>, %arg1: memref<10x6xf32, #tpu.memory_space<vmem>>, %arg2: memref<16x16xf32, #tpu.memory_space<vmem>>, %arg3: memref<16x10xf32, #tpu.memory_space<vmem>>, %arg4: memref<592x32xf32, #tpu.memory_space<vmem>>, %arg5: memref<16x7xf32, #tpu.memory_space<vmem>>, %arg6: memref<16x10xf32, #tpu.memory_space<vmem>>) attributes {dimension_semantics = [], scalar_prefetch = 0 : i64, scratch_operands = 0 : i64, tpu.core_type = #tpu.core_type<tc>} {
    %c0 = arith.constant 0 : index
    %c0_0 = arith.constant 0 : index
    %0 = vector.load %arg0[%c0, %c0_0] : memref<16x7xf32, #tpu.memory_space<vmem>>, vector<16x7xf32>
    %c0_1 = arith.constant 0 : index
    %c0_2 = arith.constant 0 : index
    %1 = vector.load %arg1[%c0_1, %c0_2] : memref<10x6xf32, #tpu.memory_space<vmem>>, vector<10x6xf32>
    %c0_3 = arith.constant 0 : index
    %c0_4 = arith.constant 0 : index
    %2 = vector.load %arg2[%c0_3, %c0_4] : memref<16x16xf32, #tpu.memory_space<vmem>>, vector<16x16xf32>
    %c0_5 = arith.constant 0 : index
    %c0_6 = arith.constant 0 : index
    %3 = vector.load %arg3[%c0_5, %c0_6] : memref<16x10xf32, #tpu.memory_space<vmem>>, vector<16x10xf32>
    %c0_7 = arith.constant 0 : index
    %c0_8 = arith.constant 0 : index
    %4 = vector.load %arg4[%c0_7, %c0_8] : memref<592x32xf32, #tpu.memory_space<vmem>>, vector<7x21xf32>
    %cst = arith.constant dense<0.000000e+00> : vector<16x21xf32>
    %5 = tpu.matmul %0, %4, %cst {dimension_numbers = #tpu.dot_dimension_numbers<[1], [0], [0], [1], [0, 0, 1, 1], [], []>} : vector<16x7xf32>, vector<7x21xf32>, vector<16x21xf32> -> vector<16x21xf32>
    %c8 = arith.constant 8 : index
    %c0_9 = arith.constant 0 : index
    %6 = vector.load %arg4[%c8, %c0_9] : memref<592x32xf32, #tpu.memory_space<vmem>>, vector<1x21xf32>
    %7 = vector.broadcast %6 : vector<1x21xf32> to vector<16x21xf32>
    %8 = arith.addf %5, %7 : vector<16x21xf32>
    %9 = vector.extract_strided_slice %8 {offsets = [0, 0], sizes = [16, 7], strides = [1, 1]} : vector<16x21xf32> to vector<16x7xf32>
    %10 = vector.extract_strided_slice %8 {offsets = [0, 7], sizes = [16, 7], strides = [1, 1]} : vector<16x21xf32> to vector<16x7xf32>
    %11 = vector.extract_strided_slice %8 {offsets = [0, 14], sizes = [16, 7], strides = [1, 1]} : vector<16x21xf32> to vector<16x7xf32>
    %c16 = arith.constant 16 : index
    %c0_10 = arith.constant 0 : index
    %12 = vector.load %arg4[%c16, %c0_10] : memref<592x32xf32, #tpu.memory_space<vmem>>, vector<1x7xf32>
    %c24 = arith.constant 24 : index
    %c0_11 = arith.constant 0 : index
    %13 = vector.load %arg4[%c24, %c0_11] : memref<592x32xf32, #tpu.memory_space<vmem>>, vector<1x7xf32>
    %c32 = arith.constant 32 : index
    %c0_12 = arith.constant 0 : index
    %14 = vector.load %arg4[%c32, %c0_12] : memref<592x32xf32, #tpu.memory_space<vmem>>, vector<7x7xf32>
    %c40 = arith.constant 40 : index
    %c0_13 = arith.constant 0 : index
    %15 = vector.load %arg4[%c40, %c0_13] : memref<592x32xf32, #tpu.memory_space<vmem>>, vector<1x7xf32>
    %cst_14 = arith.constant dense<0.000000e+00> : vector<16x16xf32>
    %16 = tpu.matmul %9, %10, %cst_14 {dimension_numbers = #tpu.dot_dimension_numbers<[1], [1], [0], [0], [0, 0, 1, 0], [], []>} : vector<16x7xf32>, vector<16x7xf32>, vector<16x16xf32> -> vector<16x16xf32>
    %cst_15 = arith.constant 0.377964467 : f32
    %17 = vector.broadcast %cst_15 : f32 to vector<16x16xf32>
    %18 = arith.mulf %16, %17 : vector<16x16xf32>
    %19 = arith.addf %18, %2 : vector<16x16xf32>
    %20 = vector.broadcast %12 : vector<1x7xf32> to vector<16x7xf32>
    %21 = arith.mulf %9, %20 : vector<16x7xf32>
    %cst_16 = arith.constant dense<0.000000e+00> : vector<16xf32>
    %22 = vector.multi_reduction <add>, %21, %cst_16 [1] : vector<16x7xf32> to vector<16xf32>
    %23 = vector.shape_cast %22 : vector<16xf32> to vector<16x1xf32>
    %cst_17 = arith.constant 0.377964467 : f32
    %24 = vector.broadcast %cst_17 : f32 to vector<16x1xf32>
    %25 = arith.mulf %23, %24 : vector<16x1xf32>
    %cst_18 = arith.constant dense<0xFF800000> : vector<16xf32>
    %26 = vector.multi_reduction <maximumf>, %19, %cst_18 [1] : vector<16x16xf32> to vector<16xf32>
    %27 = vector.shape_cast %26 : vector<16xf32> to vector<16x1xf32>
    %28 = arith.maximumf %27, %25 : vector<16x1xf32>
    %29 = vector.broadcast %28 : vector<16x1xf32> to vector<16x16xf32>
    %30 = arith.subf %19, %29 : vector<16x16xf32>
    %31 = math.exp %30 : vector<16x16xf32>
    %32 = arith.subf %25, %28 : vector<16x1xf32>
    %33 = math.exp %32 : vector<16x1xf32>
    %cst_19 = arith.constant dense<0.000000e+00> : vector<16xf32>
    %34 = vector.multi_reduction <add>, %31, %cst_19 [1] : vector<16x16xf32> to vector<16xf32>
    %35 = vector.shape_cast %34 : vector<16xf32> to vector<16x1xf32>
    %36 = arith.addf %35, %33 : vector<16x1xf32>
    %cst_20 = arith.constant dense<0.000000e+00> : vector<16x7xf32>
    %37 = tpu.matmul %31, %11, %cst_20 {dimension_numbers = #tpu.dot_dimension_numbers<[1], [0], [0], [1], [0, 0, 1, 1], [], []>} : vector<16x16xf32>, vector<16x7xf32>, vector<16x7xf32> -> vector<16x7xf32>
    %38 = vector.broadcast %33 : vector<16x1xf32> to vector<16x7xf32>
    %39 = vector.broadcast %13 : vector<1x7xf32> to vector<16x7xf32>
    %40 = arith.mulf %38, %39 : vector<16x7xf32>
    %41 = arith.addf %37, %40 : vector<16x7xf32>
    %42 = tpu.reciprocal %36 : vector<16x1xf32> -> vector<16x1xf32>
    %43 = vector.broadcast %42 : vector<16x1xf32> to vector<16x7xf32>
    %44 = arith.mulf %41, %43 : vector<16x7xf32>
    %cst_21 = arith.constant dense<0.000000e+00> : vector<16x7xf32>
    %45 = tpu.matmul %44, %14, %cst_21 {dimension_numbers = #tpu.dot_dimension_numbers<[1], [0], [0], [1], [0, 0, 1, 1], [], []>} : vector<16x7xf32>, vector<7x7xf32>, vector<16x7xf32> -> vector<16x7xf32>
    %46 = vector.broadcast %15 : vector<1x7xf32> to vector<16x7xf32>
    %47 = arith.addf %45, %46 : vector<16x7xf32>
    %48 = arith.addf %47, %0 : vector<16x7xf32>
    %c112 = arith.constant 112 : index
    %c0_22 = arith.constant 0 : index
    %49 = vector.load %arg4[%c112, %c0_22] : memref<592x32xf32, #tpu.memory_space<vmem>>, vector<1x7xf32>
    %c120 = arith.constant 120 : index
    %c0_23 = arith.constant 0 : index
    %50 = vector.load %arg4[%c120, %c0_23] : memref<592x32xf32, #tpu.memory_space<vmem>>, vector<1x7xf32>
    %cst_24 = arith.constant dense<0.000000e+00> : vector<16xf32>
    %51 = vector.multi_reduction <add>, %48, %cst_24 [1] : vector<16x7xf32> to vector<16xf32>
    %52 = vector.shape_cast %51 : vector<16xf32> to vector<16x1xf32>
    %cst_25 = arith.constant 7.000000e+00 : f32
    %53 = vector.broadcast %cst_25 : f32 to vector<16x1xf32>
    %54 = arith.divf %52, %53 : vector<16x1xf32>
    %55 = vector.broadcast %54 : vector<16x1xf32> to vector<16x7xf32>
    %56 = arith.subf %48, %55 : vector<16x7xf32>
    %57 = arith.mulf %56, %56 : vector<16x7xf32>
    %cst_26 = arith.constant dense<0.000000e+00> : vector<16xf32>
    %58 = vector.multi_reduction <add>, %57, %cst_26 [1] : vector<16x7xf32> to vector<16xf32>
    %59 = vector.shape_cast %58 : vector<16xf32> to vector<16x1xf32>
    %cst_27 = arith.constant 7.000000e+00 : f32
    %60 = vector.broadcast %cst_27 : f32 to vector<16x1xf32>
    %61 = arith.divf %59, %60 : vector<16x1xf32>
    %62 = vector.broadcast %54 : vector<16x1xf32> to vector<16x7xf32>
    %63 = arith.subf %48, %62 : vector<16x7xf32>
    %cst_28 = arith.constant 9.99999974E-6 : f32
    %64 = vector.broadcast %cst_28 : f32 to vector<16x1xf32>
    %65 = arith.addf %61, %64 : vector<16x1xf32>
    %66 = math.rsqrt %65 : vector<16x1xf32>
    %67 = vector.broadcast %66 : vector<16x1xf32> to vector<16x7xf32>
    %68 = arith.mulf %63, %67 : vector<16x7xf32>
    %69 = vector.broadcast %49 : vector<1x7xf32> to vector<16x7xf32>
    %70 = arith.mulf %68, %69 : vector<16x7xf32>
    %71 = vector.broadcast %50 : vector<1x7xf32> to vector<16x7xf32>
    %72 = arith.addf %70, %71 : vector<16x7xf32>
    %c48 = arith.constant 48 : index
    %c0_29 = arith.constant 0 : index
    %73 = vector.load %arg4[%c48, %c0_29] : memref<592x32xf32, #tpu.memory_space<vmem>>, vector<7x7xf32>
    %cst_30 = arith.constant dense<0.000000e+00> : vector<16x7xf32>
    %74 = tpu.matmul %72, %73, %cst_30 {dimension_numbers = #tpu.dot_dimension_numbers<[1], [0], [0], [1], [0, 0, 1, 1], [], []>} : vector<16x7xf32>, vector<7x7xf32>, vector<16x7xf32> -> vector<16x7xf32>
    %c56 = arith.constant 56 : index
    %c0_31 = arith.constant 0 : index
    %75 = vector.load %arg4[%c56, %c0_31] : memref<592x32xf32, #tpu.memory_space<vmem>>, vector<1x7xf32>
    %76 = vector.broadcast %75 : vector<1x7xf32> to vector<16x7xf32>
    %77 = arith.addf %74, %76 : vector<16x7xf32>
    %c64 = arith.constant 64 : index
    %c0_32 = arith.constant 0 : index
    %78 = vector.load %arg4[%c64, %c0_32] : memref<592x32xf32, #tpu.memory_space<vmem>>, vector<6x14xf32>
    %cst_33 = arith.constant dense<0.000000e+00> : vector<10x14xf32>
    %79 = tpu.matmul %1, %78, %cst_33 {dimension_numbers = #tpu.dot_dimension_numbers<[1], [0], [0], [1], [0, 0, 1, 1], [], []>} : vector<10x6xf32>, vector<6x14xf32>, vector<10x14xf32> -> vector<10x14xf32>
    %c72 = arith.constant 72 : index
    %c0_34 = arith.constant 0 : index
    %80 = vector.load %arg4[%c72, %c0_34] : memref<592x32xf32, #tpu.memory_space<vmem>>, vector<1x14xf32>
    %81 = vector.broadcast %80 : vector<1x14xf32> to vector<10x14xf32>
    %82 = arith.addf %79, %81 : vector<10x14xf32>
    %83 = vector.extract_strided_slice %82 {offsets = [0, 0], sizes = [10, 7], strides = [1, 1]} : vector<10x14xf32> to vector<10x7xf32>
    %84 = vector.extract_strided_slice %82 {offsets = [0, 7], sizes = [10, 7], strides = [1, 1]} : vector<10x14xf32> to vector<10x7xf32>
    %c80 = arith.constant 80 : index
    %c0_35 = arith.constant 0 : index
    %85 = vector.load %arg4[%c80, %c0_35] : memref<592x32xf32, #tpu.memory_space<vmem>>, vector<1x7xf32>
    %c88 = arith.constant 88 : index
    %c0_36 = arith.constant 0 : index
    %86 = vector.load %arg4[%c88, %c0_36] : memref<592x32xf32, #tpu.memory_space<vmem>>, vector<1x7xf32>
    %c96 = arith.constant 96 : index
    %c0_37 = arith.constant 0 : index
    %87 = vector.load %arg4[%c96, %c0_37] : memref<592x32xf32, #tpu.memory_space<vmem>>, vector<7x7xf32>
    %c104 = arith.constant 104 : index
    %c0_38 = arith.constant 0 : index
    %88 = vector.load %arg4[%c104, %c0_38] : memref<592x32xf32, #tpu.memory_space<vmem>>, vector<1x7xf32>
    %cst_39 = arith.constant dense<0.000000e+00> : vector<16x10xf32>
    %89 = tpu.matmul %77, %83, %cst_39 {dimension_numbers = #tpu.dot_dimension_numbers<[1], [1], [0], [0], [0, 0, 1, 0], [], []>} : vector<16x7xf32>, vector<10x7xf32>, vector<16x10xf32> -> vector<16x10xf32>
    %cst_40 = arith.constant 0.377964467 : f32
    %90 = vector.broadcast %cst_40 : f32 to vector<16x10xf32>
    %91 = arith.mulf %89, %90 : vector<16x10xf32>
    %92 = arith.addf %91, %3 : vector<16x10xf32>
    %93 = vector.broadcast %85 : vector<1x7xf32> to vector<16x7xf32>
    %94 = arith.mulf %77, %93 : vector<16x7xf32>
    %cst_41 = arith.constant dense<0.000000e+00> : vector<16xf32>
    %95 = vector.multi_reduction <add>, %94, %cst_41 [1] : vector<16x7xf32> to vector<16xf32>
    %96 = vector.shape_cast %95 : vector<16xf32> to vector<16x1xf32>
    %cst_42 = arith.constant 0.377964467 : f32
    %97 = vector.broadcast %cst_42 : f32 to vector<16x1xf32>
    %98 = arith.mulf %96, %97 : vector<16x1xf32>
    %cst_43 = arith.constant dense<0xFF800000> : vector<16xf32>
    %99 = vector.multi_reduction <maximumf>, %92, %cst_43 [1] : vector<16x10xf32> to vector<16xf32>
    %100 = vector.shape_cast %99 : vector<16xf32> to vector<16x1xf32>
    %101 = arith.maximumf %100, %98 : vector<16x1xf32>
    %102 = vector.broadcast %101 : vector<16x1xf32> to vector<16x10xf32>
    %103 = arith.subf %92, %102 : vector<16x10xf32>
    %104 = math.exp %103 : vector<16x10xf32>
    %105 = arith.subf %98, %101 : vector<16x1xf32>
    %106 = math.exp %105 : vector<16x1xf32>
    %cst_44 = arith.constant dense<0.000000e+00> : vector<16xf32>
    %107 = vector.multi_reduction <add>, %104, %cst_44 [1] : vector<16x10xf32> to vector<16xf32>
    %108 = vector.shape_cast %107 : vector<16xf32> to vector<16x1xf32>
    %109 = arith.addf %108, %106 : vector<16x1xf32>
    %cst_45 = arith.constant dense<0.000000e+00> : vector<16x7xf32>
    %110 = tpu.matmul %104, %84, %cst_45 {dimension_numbers = #tpu.dot_dimension_numbers<[1], [0], [0], [1], [0, 0, 1, 1], [], []>} : vector<16x10xf32>, vector<10x7xf32>, vector<16x7xf32> -> vector<16x7xf32>
    %111 = vector.broadcast %106 : vector<16x1xf32> to vector<16x7xf32>
    %112 = vector.broadcast %86 : vector<1x7xf32> to vector<16x7xf32>
    %113 = arith.mulf %111, %112 : vector<16x7xf32>
    %114 = arith.addf %110, %113 : vector<16x7xf32>
    %115 = tpu.reciprocal %109 : vector<16x1xf32> -> vector<16x1xf32>
    %116 = vector.broadcast %115 : vector<16x1xf32> to vector<16x7xf32>
    %117 = arith.mulf %114, %116 : vector<16x7xf32>
    %cst_46 = arith.constant dense<0.000000e+00> : vector<16x7xf32>
    %118 = tpu.matmul %117, %87, %cst_46 {dimension_numbers = #tpu.dot_dimension_numbers<[1], [0], [0], [1], [0, 0, 1, 1], [], []>} : vector<16x7xf32>, vector<7x7xf32>, vector<16x7xf32> -> vector<16x7xf32>
    %119 = vector.broadcast %88 : vector<1x7xf32> to vector<16x7xf32>
    %120 = arith.addf %118, %119 : vector<16x7xf32>
    %121 = arith.addf %120, %72 : vector<16x7xf32>
    %c128 = arith.constant 128 : index
    %c0_47 = arith.constant 0 : index
    %122 = vector.load %arg4[%c128, %c0_47] : memref<592x32xf32, #tpu.memory_space<vmem>>, vector<1x7xf32>
    %c136 = arith.constant 136 : index
    %c0_48 = arith.constant 0 : index
    %123 = vector.load %arg4[%c136, %c0_48] : memref<592x32xf32, #tpu.memory_space<vmem>>, vector<1x7xf32>
    %cst_49 = arith.constant dense<0.000000e+00> : vector<16xf32>
    %124 = vector.multi_reduction <add>, %121, %cst_49 [1] : vector<16x7xf32> to vector<16xf32>
    %125 = vector.shape_cast %124 : vector<16xf32> to vector<16x1xf32>
    %cst_50 = arith.constant 7.000000e+00 : f32
    %126 = vector.broadcast %cst_50 : f32 to vector<16x1xf32>
    %127 = arith.divf %125, %126 : vector<16x1xf32>
    %128 = vector.broadcast %127 : vector<16x1xf32> to vector<16x7xf32>
    %129 = arith.subf %121, %128 : vector<16x7xf32>
    %130 = arith.mulf %129, %129 : vector<16x7xf32>
    %cst_51 = arith.constant dense<0.000000e+00> : vector<16xf32>
    %131 = vector.multi_reduction <add>, %130, %cst_51 [1] : vector<16x7xf32> to vector<16xf32>
    %132 = vector.shape_cast %131 : vector<16xf32> to vector<16x1xf32>
    %cst_52 = arith.constant 7.000000e+00 : f32
    %133 = vector.broadcast %cst_52 : f32 to vector<16x1xf32>
    %134 = arith.divf %132, %133 : vector<16x1xf32>
    %135 = vector.broadcast %127 : vector<16x1xf32> to vector<16x7xf32>
    %136 = arith.subf %121, %135 : vector<16x7xf32>
    %cst_53 = arith.constant 9.99999974E-6 : f32
    %137 = vector.broadcast %cst_53 : f32 to vector<16x1xf32>
    %138 = arith.addf %134, %137 : vector<16x1xf32>
    %139 = math.rsqrt %138 : vector<16x1xf32>
    %140 = vector.broadcast %139 : vector<16x1xf32> to vector<16x7xf32>
    %141 = arith.mulf %136, %140 : vector<16x7xf32>
    %142 = vector.broadcast %122 : vector<1x7xf32> to vector<16x7xf32>
    %143 = arith.mulf %141, %142 : vector<16x7xf32>
    %144 = vector.broadcast %123 : vector<1x7xf32> to vector<16x7xf32>
    %145 = arith.addf %143, %144 : vector<16x7xf32>
    %c160 = arith.constant 160 : index
    %c0_54 = arith.constant 0 : index
    %146 = vector.load %arg4[%c160, %c0_54] : memref<592x32xf32, #tpu.memory_space<vmem>>, vector<7x3xf32>
    %cst_55 = arith.constant dense<0.000000e+00> : vector<16x3xf32>
    %147 = tpu.matmul %145, %146, %cst_55 {dimension_numbers = #tpu.dot_dimension_numbers<[1], [0], [0], [1], [0, 0, 1, 1], [], []>} : vector<16x7xf32>, vector<7x3xf32>, vector<16x3xf32> -> vector<16x3xf32>
    %c168 = arith.constant 168 : index
    %c0_56 = arith.constant 0 : index
    %148 = vector.load %arg4[%c168, %c0_56] : memref<592x32xf32, #tpu.memory_space<vmem>>, vector<1x3xf32>
    %149 = vector.broadcast %148 : vector<1x3xf32> to vector<16x3xf32>
    %150 = arith.addf %147, %149 : vector<16x3xf32>
    %cst_57 = arith.constant 0.000000e+00 : f32
    %151 = vector.broadcast %cst_57 : f32 to vector<16x3xf32>
    %152 = arith.maximumf %150, %151 : vector<16x3xf32>
    %c176 = arith.constant 176 : index
    %c0_58 = arith.constant 0 : index
    %153 = vector.load %arg4[%c176, %c0_58] : memref<592x32xf32, #tpu.memory_space<vmem>>, vector<3x7xf32>
    %cst_59 = arith.constant dense<0.000000e+00> : vector<16x7xf32>
    %154 = tpu.matmul %152, %153, %cst_59 {dimension_numbers = #tpu.dot_dimension_numbers<[1], [0], [0], [1], [0, 0, 1, 1], [], []>} : vector<16x3xf32>, vector<3x7xf32>, vector<16x7xf32> -> vector<16x7xf32>
    %c184 = arith.constant 184 : index
    %c0_60 = arith.constant 0 : index
    %155 = vector.load %arg4[%c184, %c0_60] : memref<592x32xf32, #tpu.memory_space<vmem>>, vector<1x7xf32>
    %156 = vector.broadcast %155 : vector<1x7xf32> to vector<16x7xf32>
    %157 = arith.addf %154, %156 : vector<16x7xf32>
    %cst_61 = arith.constant 0.000000e+00 : f32
    %158 = vector.broadcast %cst_61 : f32 to vector<16x7xf32>
    %159 = arith.maximumf %157, %158 : vector<16x7xf32>
    %160 = arith.addf %159, %145 : vector<16x7xf32>
    %c144 = arith.constant 144 : index
    %c0_62 = arith.constant 0 : index
    %161 = vector.load %arg4[%c144, %c0_62] : memref<592x32xf32, #tpu.memory_space<vmem>>, vector<1x7xf32>
    %c152 = arith.constant 152 : index
    %c0_63 = arith.constant 0 : index
    %162 = vector.load %arg4[%c152, %c0_63] : memref<592x32xf32, #tpu.memory_space<vmem>>, vector<1x7xf32>
    %cst_64 = arith.constant dense<0.000000e+00> : vector<16xf32>
    %163 = vector.multi_reduction <add>, %160, %cst_64 [1] : vector<16x7xf32> to vector<16xf32>
    %164 = vector.shape_cast %163 : vector<16xf32> to vector<16x1xf32>
    %cst_65 = arith.constant 7.000000e+00 : f32
    %165 = vector.broadcast %cst_65 : f32 to vector<16x1xf32>
    %166 = arith.divf %164, %165 : vector<16x1xf32>
    %167 = vector.broadcast %166 : vector<16x1xf32> to vector<16x7xf32>
    %168 = arith.subf %160, %167 : vector<16x7xf32>
    %169 = arith.mulf %168, %168 : vector<16x7xf32>
    %cst_66 = arith.constant dense<0.000000e+00> : vector<16xf32>
    %170 = vector.multi_reduction <add>, %169, %cst_66 [1] : vector<16x7xf32> to vector<16xf32>
    %171 = vector.shape_cast %170 : vector<16xf32> to vector<16x1xf32>
    %cst_67 = arith.constant 7.000000e+00 : f32
    %172 = vector.broadcast %cst_67 : f32 to vector<16x1xf32>
    %173 = arith.divf %171, %172 : vector<16x1xf32>
    %174 = vector.broadcast %166 : vector<16x1xf32> to vector<16x7xf32>
    %175 = arith.subf %160, %174 : vector<16x7xf32>
    %cst_68 = arith.constant 9.99999974E-6 : f32
    %176 = vector.broadcast %cst_68 : f32 to vector<16x1xf32>
    %177 = arith.addf %173, %176 : vector<16x1xf32>
    %178 = math.rsqrt %177 : vector<16x1xf32>
    %179 = vector.broadcast %178 : vector<16x1xf32> to vector<16x7xf32>
    %180 = arith.mulf %175, %179 : vector<16x7xf32>
    %181 = vector.broadcast %161 : vector<1x7xf32> to vector<16x7xf32>
    %182 = arith.mulf %180, %181 : vector<16x7xf32>
    %183 = vector.broadcast %162 : vector<1x7xf32> to vector<16x7xf32>
    %184 = arith.addf %182, %183 : vector<16x7xf32>
    %c192 = arith.constant 192 : index
    %c0_69 = arith.constant 0 : index
    %185 = vector.load %arg4[%c192, %c0_69] : memref<592x32xf32, #tpu.memory_space<vmem>>, vector<7x21xf32>
    %cst_70 = arith.constant dense<0.000000e+00> : vector<16x21xf32>
    %186 = tpu.matmul %184, %185, %cst_70 {dimension_numbers = #tpu.dot_dimension_numbers<[1], [0], [0], [1], [0, 0, 1, 1], [], []>} : vector<16x7xf32>, vector<7x21xf32>, vector<16x21xf32> -> vector<16x21xf32>
    %c200 = arith.constant 200 : index
    %c0_71 = arith.constant 0 : index
    %187 = vector.load %arg4[%c200, %c0_71] : memref<592x32xf32, #tpu.memory_space<vmem>>, vector<1x21xf32>
    %188 = vector.broadcast %187 : vector<1x21xf32> to vector<16x21xf32>
    %189 = arith.addf %186, %188 : vector<16x21xf32>
    %190 = vector.extract_strided_slice %189 {offsets = [0, 0], sizes = [16, 7], strides = [1, 1]} : vector<16x21xf32> to vector<16x7xf32>
    %191 = vector.extract_strided_slice %189 {offsets = [0, 7], sizes = [16, 7], strides = [1, 1]} : vector<16x21xf32> to vector<16x7xf32>
    %192 = vector.extract_strided_slice %189 {offsets = [0, 14], sizes = [16, 7], strides = [1, 1]} : vector<16x21xf32> to vector<16x7xf32>
    %c208 = arith.constant 208 : index
    %c0_72 = arith.constant 0 : index
    %193 = vector.load %arg4[%c208, %c0_72] : memref<592x32xf32, #tpu.memory_space<vmem>>, vector<1x7xf32>
    %c216 = arith.constant 216 : index
    %c0_73 = arith.constant 0 : index
    %194 = vector.load %arg4[%c216, %c0_73] : memref<592x32xf32, #tpu.memory_space<vmem>>, vector<1x7xf32>
    %c224 = arith.constant 224 : index
    %c0_74 = arith.constant 0 : index
    %195 = vector.load %arg4[%c224, %c0_74] : memref<592x32xf32, #tpu.memory_space<vmem>>, vector<7x7xf32>
    %c232 = arith.constant 232 : index
    %c0_75 = arith.constant 0 : index
    %196 = vector.load %arg4[%c232, %c0_75] : memref<592x32xf32, #tpu.memory_space<vmem>>, vector<1x7xf32>
    %cst_76 = arith.constant dense<0.000000e+00> : vector<16x16xf32>
    %197 = tpu.matmul %190, %191, %cst_76 {dimension_numbers = #tpu.dot_dimension_numbers<[1], [1], [0], [0], [0, 0, 1, 0], [], []>} : vector<16x7xf32>, vector<16x7xf32>, vector<16x16xf32> -> vector<16x16xf32>
    %cst_77 = arith.constant 0.377964467 : f32
    %198 = vector.broadcast %cst_77 : f32 to vector<16x16xf32>
    %199 = arith.mulf %197, %198 : vector<16x16xf32>
    %200 = arith.addf %199, %2 : vector<16x16xf32>
    %201 = vector.broadcast %193 : vector<1x7xf32> to vector<16x7xf32>
    %202 = arith.mulf %190, %201 : vector<16x7xf32>
    %cst_78 = arith.constant dense<0.000000e+00> : vector<16xf32>
    %203 = vector.multi_reduction <add>, %202, %cst_78 [1] : vector<16x7xf32> to vector<16xf32>
    %204 = vector.shape_cast %203 : vector<16xf32> to vector<16x1xf32>
    %cst_79 = arith.constant 0.377964467 : f32
    %205 = vector.broadcast %cst_79 : f32 to vector<16x1xf32>
    %206 = arith.mulf %204, %205 : vector<16x1xf32>
    %cst_80 = arith.constant dense<0xFF800000> : vector<16xf32>
    %207 = vector.multi_reduction <maximumf>, %200, %cst_80 [1] : vector<16x16xf32> to vector<16xf32>
    %208 = vector.shape_cast %207 : vector<16xf32> to vector<16x1xf32>
    %209 = arith.maximumf %208, %206 : vector<16x1xf32>
    %210 = vector.broadcast %209 : vector<16x1xf32> to vector<16x16xf32>
    %211 = arith.subf %200, %210 : vector<16x16xf32>
    %212 = math.exp %211 : vector<16x16xf32>
    %213 = arith.subf %206, %209 : vector<16x1xf32>
    %214 = math.exp %213 : vector<16x1xf32>
    %cst_81 = arith.constant dense<0.000000e+00> : vector<16xf32>
    %215 = vector.multi_reduction <add>, %212, %cst_81 [1] : vector<16x16xf32> to vector<16xf32>
    %216 = vector.shape_cast %215 : vector<16xf32> to vector<16x1xf32>
    %217 = arith.addf %216, %214 : vector<16x1xf32>
    %cst_82 = arith.constant dense<0.000000e+00> : vector<16x7xf32>
    %218 = tpu.matmul %212, %192, %cst_82 {dimension_numbers = #tpu.dot_dimension_numbers<[1], [0], [0], [1], [0, 0, 1, 1], [], []>} : vector<16x16xf32>, vector<16x7xf32>, vector<16x7xf32> -> vector<16x7xf32>
    %219 = vector.broadcast %214 : vector<16x1xf32> to vector<16x7xf32>
    %220 = vector.broadcast %194 : vector<1x7xf32> to vector<16x7xf32>
    %221 = arith.mulf %219, %220 : vector<16x7xf32>
    %222 = arith.addf %218, %221 : vector<16x7xf32>
    %223 = tpu.reciprocal %217 : vector<16x1xf32> -> vector<16x1xf32>
    %224 = vector.broadcast %223 : vector<16x1xf32> to vector<16x7xf32>
    %225 = arith.mulf %222, %224 : vector<16x7xf32>
    %cst_83 = arith.constant dense<0.000000e+00> : vector<16x7xf32>
    %226 = tpu.matmul %225, %195, %cst_83 {dimension_numbers = #tpu.dot_dimension_numbers<[1], [0], [0], [1], [0, 0, 1, 1], [], []>} : vector<16x7xf32>, vector<7x7xf32>, vector<16x7xf32> -> vector<16x7xf32>
    %227 = vector.broadcast %196 : vector<1x7xf32> to vector<16x7xf32>
    %228 = arith.addf %226, %227 : vector<16x7xf32>
    %229 = arith.addf %228, %184 : vector<16x7xf32>
    %c304 = arith.constant 304 : index
    %c0_84 = arith.constant 0 : index
    %230 = vector.load %arg4[%c304, %c0_84] : memref<592x32xf32, #tpu.memory_space<vmem>>, vector<1x7xf32>
    %c312 = arith.constant 312 : index
    %c0_85 = arith.constant 0 : index
    %231 = vector.load %arg4[%c312, %c0_85] : memref<592x32xf32, #tpu.memory_space<vmem>>, vector<1x7xf32>
    %cst_86 = arith.constant dense<0.000000e+00> : vector<16xf32>
    %232 = vector.multi_reduction <add>, %229, %cst_86 [1] : vector<16x7xf32> to vector<16xf32>
    %233 = vector.shape_cast %232 : vector<16xf32> to vector<16x1xf32>
    %cst_87 = arith.constant 7.000000e+00 : f32
    %234 = vector.broadcast %cst_87 : f32 to vector<16x1xf32>
    %235 = arith.divf %233, %234 : vector<16x1xf32>
    %236 = vector.broadcast %235 : vector<16x1xf32> to vector<16x7xf32>
    %237 = arith.subf %229, %236 : vector<16x7xf32>
    %238 = arith.mulf %237, %237 : vector<16x7xf32>
    %cst_88 = arith.constant dense<0.000000e+00> : vector<16xf32>
    %239 = vector.multi_reduction <add>, %238, %cst_88 [1] : vector<16x7xf32> to vector<16xf32>
    %240 = vector.shape_cast %239 : vector<16xf32> to vector<16x1xf32>
    %cst_89 = arith.constant 7.000000e+00 : f32
    %241 = vector.broadcast %cst_89 : f32 to vector<16x1xf32>
    %242 = arith.divf %240, %241 : vector<16x1xf32>
    %243 = vector.broadcast %235 : vector<16x1xf32> to vector<16x7xf32>
    %244 = arith.subf %229, %243 : vector<16x7xf32>
    %cst_90 = arith.constant 9.99999974E-6 : f32
    %245 = vector.broadcast %cst_90 : f32 to vector<16x1xf32>
    %246 = arith.addf %242, %245 : vector<16x1xf32>
    %247 = math.rsqrt %246 : vector<16x1xf32>
    %248 = vector.broadcast %247 : vector<16x1xf32> to vector<16x7xf32>
    %249 = arith.mulf %244, %248 : vector<16x7xf32>
    %250 = vector.broadcast %230 : vector<1x7xf32> to vector<16x7xf32>
    %251 = arith.mulf %249, %250 : vector<16x7xf32>
    %252 = vector.broadcast %231 : vector<1x7xf32> to vector<16x7xf32>
    %253 = arith.addf %251, %252 : vector<16x7xf32>
    %c240 = arith.constant 240 : index
    %c0_91 = arith.constant 0 : index
    %254 = vector.load %arg4[%c240, %c0_91] : memref<592x32xf32, #tpu.memory_space<vmem>>, vector<7x7xf32>
    %cst_92 = arith.constant dense<0.000000e+00> : vector<16x7xf32>
    %255 = tpu.matmul %253, %254, %cst_92 {dimension_numbers = #tpu.dot_dimension_numbers<[1], [0], [0], [1], [0, 0, 1, 1], [], []>} : vector<16x7xf32>, vector<7x7xf32>, vector<16x7xf32> -> vector<16x7xf32>
    %c248 = arith.constant 248 : index
    %c0_93 = arith.constant 0 : index
    %256 = vector.load %arg4[%c248, %c0_93] : memref<592x32xf32, #tpu.memory_space<vmem>>, vector<1x7xf32>
    %257 = vector.broadcast %256 : vector<1x7xf32> to vector<16x7xf32>
    %258 = arith.addf %255, %257 : vector<16x7xf32>
    %c256 = arith.constant 256 : index
    %c0_94 = arith.constant 0 : index
    %259 = vector.load %arg4[%c256, %c0_94] : memref<592x32xf32, #tpu.memory_space<vmem>>, vector<6x14xf32>
    %cst_95 = arith.constant dense<0.000000e+00> : vector<10x14xf32>
    %260 = tpu.matmul %1, %259, %cst_95 {dimension_numbers = #tpu.dot_dimension_numbers<[1], [0], [0], [1], [0, 0, 1, 1], [], []>} : vector<10x6xf32>, vector<6x14xf32>, vector<10x14xf32> -> vector<10x14xf32>
    %c264 = arith.constant 264 : index
    %c0_96 = arith.constant 0 : index
    %261 = vector.load %arg4[%c264, %c0_96] : memref<592x32xf32, #tpu.memory_space<vmem>>, vector<1x14xf32>
    %262 = vector.broadcast %261 : vector<1x14xf32> to vector<10x14xf32>
    %263 = arith.addf %260, %262 : vector<10x14xf32>
    %264 = vector.extract_strided_slice %263 {offsets = [0, 0], sizes = [10, 7], strides = [1, 1]} : vector<10x14xf32> to vector<10x7xf32>
    %265 = vector.extract_strided_slice %263 {offsets = [0, 7], sizes = [10, 7], strides = [1, 1]} : vector<10x14xf32> to vector<10x7xf32>
    %c272 = arith.constant 272 : index
    %c0_97 = arith.constant 0 : index
    %266 = vector.load %arg4[%c272, %c0_97] : memref<592x32xf32, #tpu.memory_space<vmem>>, vector<1x7xf32>
    %c280 = arith.constant 280 : index
    %c0_98 = arith.constant 0 : index
    %267 = vector.load %arg4[%c280, %c0_98] : memref<592x32xf32, #tpu.memory_space<vmem>>, vector<1x7xf32>
    %c288 = arith.constant 288 : index
    %c0_99 = arith.constant 0 : index
    %268 = vector.load %arg4[%c288, %c0_99] : memref<592x32xf32, #tpu.memory_space<vmem>>, vector<7x7xf32>
    %c296 = arith.constant 296 : index
    %c0_100 = arith.constant 0 : index
    %269 = vector.load %arg4[%c296, %c0_100] : memref<592x32xf32, #tpu.memory_space<vmem>>, vector<1x7xf32>
    %cst_101 = arith.constant dense<0.000000e+00> : vector<16x10xf32>
    %270 = tpu.matmul %258, %264, %cst_101 {dimension_numbers = #tpu.dot_dimension_numbers<[1], [1], [0], [0], [0, 0, 1, 0], [], []>} : vector<16x7xf32>, vector<10x7xf32>, vector<16x10xf32> -> vector<16x10xf32>
    %cst_102 = arith.constant 0.377964467 : f32
    %271 = vector.broadcast %cst_102 : f32 to vector<16x10xf32>
    %272 = arith.mulf %270, %271 : vector<16x10xf32>
    %273 = arith.addf %272, %3 : vector<16x10xf32>
    %274 = vector.broadcast %266 : vector<1x7xf32> to vector<16x7xf32>
    %275 = arith.mulf %258, %274 : vector<16x7xf32>
    %cst_103 = arith.constant dense<0.000000e+00> : vector<16xf32>
    %276 = vector.multi_reduction <add>, %275, %cst_103 [1] : vector<16x7xf32> to vector<16xf32>
    %277 = vector.shape_cast %276 : vector<16xf32> to vector<16x1xf32>
    %cst_104 = arith.constant 0.377964467 : f32
    %278 = vector.broadcast %cst_104 : f32 to vector<16x1xf32>
    %279 = arith.mulf %277, %278 : vector<16x1xf32>
    %cst_105 = arith.constant dense<0xFF800000> : vector<16xf32>
    %280 = vector.multi_reduction <maximumf>, %273, %cst_105 [1] : vector<16x10xf32> to vector<16xf32>
    %281 = vector.shape_cast %280 : vector<16xf32> to vector<16x1xf32>
    %282 = arith.maximumf %281, %279 : vector<16x1xf32>
    %283 = vector.broadcast %282 : vector<16x1xf32> to vector<16x10xf32>
    %284 = arith.subf %273, %283 : vector<16x10xf32>
    %285 = math.exp %284 : vector<16x10xf32>
    %286 = arith.subf %279, %282 : vector<16x1xf32>
    %287 = math.exp %286 : vector<16x1xf32>
    %cst_106 = arith.constant dense<0.000000e+00> : vector<16xf32>
    %288 = vector.multi_reduction <add>, %285, %cst_106 [1] : vector<16x10xf32> to vector<16xf32>
    %289 = vector.shape_cast %288 : vector<16xf32> to vector<16x1xf32>
    %290 = arith.addf %289, %287 : vector<16x1xf32>
    %cst_107 = arith.constant dense<0.000000e+00> : vector<16x7xf32>
    %291 = tpu.matmul %285, %265, %cst_107 {dimension_numbers = #tpu.dot_dimension_numbers<[1], [0], [0], [1], [0, 0, 1, 1], [], []>} : vector<16x10xf32>, vector<10x7xf32>, vector<16x7xf32> -> vector<16x7xf32>
    %292 = vector.broadcast %287 : vector<16x1xf32> to vector<16x7xf32>
    %293 = vector.broadcast %267 : vector<1x7xf32> to vector<16x7xf32>
    %294 = arith.mulf %292, %293 : vector<16x7xf32>
    %295 = arith.addf %291, %294 : vector<16x7xf32>
    %296 = tpu.reciprocal %290 : vector<16x1xf32> -> vector<16x1xf32>
    %297 = vector.broadcast %296 : vector<16x1xf32> to vector<16x7xf32>
    %298 = arith.mulf %295, %297 : vector<16x7xf32>
    %cst_108 = arith.constant dense<0.000000e+00> : vector<16x7xf32>
    %299 = tpu.matmul %298, %268, %cst_108 {dimension_numbers = #tpu.dot_dimension_numbers<[1], [0], [0], [1], [0, 0, 1, 1], [], []>} : vector<16x7xf32>, vector<7x7xf32>, vector<16x7xf32> -> vector<16x7xf32>
    %300 = vector.broadcast %269 : vector<1x7xf32> to vector<16x7xf32>
    %301 = arith.addf %299, %300 : vector<16x7xf32>
    %302 = arith.addf %301, %253 : vector<16x7xf32>
    %c320 = arith.constant 320 : index
    %c0_109 = arith.constant 0 : index
    %303 = vector.load %arg4[%c320, %c0_109] : memref<592x32xf32, #tpu.memory_space<vmem>>, vector<1x7xf32>
    %c328 = arith.constant 328 : index
    %c0_110 = arith.constant 0 : index
    %304 = vector.load %arg4[%c328, %c0_110] : memref<592x32xf32, #tpu.memory_space<vmem>>, vector<1x7xf32>
    %cst_111 = arith.constant dense<0.000000e+00> : vector<16xf32>
    %305 = vector.multi_reduction <add>, %302, %cst_111 [1] : vector<16x7xf32> to vector<16xf32>
    %306 = vector.shape_cast %305 : vector<16xf32> to vector<16x1xf32>
    %cst_112 = arith.constant 7.000000e+00 : f32
    %307 = vector.broadcast %cst_112 : f32 to vector<16x1xf32>
    %308 = arith.divf %306, %307 : vector<16x1xf32>
    %309 = vector.broadcast %308 : vector<16x1xf32> to vector<16x7xf32>
    %310 = arith.subf %302, %309 : vector<16x7xf32>
    %311 = arith.mulf %310, %310 : vector<16x7xf32>
    %cst_113 = arith.constant dense<0.000000e+00> : vector<16xf32>
    %312 = vector.multi_reduction <add>, %311, %cst_113 [1] : vector<16x7xf32> to vector<16xf32>
    %313 = vector.shape_cast %312 : vector<16xf32> to vector<16x1xf32>
    %cst_114 = arith.constant 7.000000e+00 : f32
    %314 = vector.broadcast %cst_114 : f32 to vector<16x1xf32>
    %315 = arith.divf %313, %314 : vector<16x1xf32>
    %316 = vector.broadcast %308 : vector<16x1xf32> to vector<16x7xf32>
    %317 = arith.subf %302, %316 : vector<16x7xf32>
    %cst_115 = arith.constant 9.99999974E-6 : f32
    %318 = vector.broadcast %cst_115 : f32 to vector<16x1xf32>
    %319 = arith.addf %315, %318 : vector<16x1xf32>
    %320 = math.rsqrt %319 : vector<16x1xf32>
    %321 = vector.broadcast %320 : vector<16x1xf32> to vector<16x7xf32>
    %322 = arith.mulf %317, %321 : vector<16x7xf32>
    %323 = vector.broadcast %303 : vector<1x7xf32> to vector<16x7xf32>
    %324 = arith.mulf %322, %323 : vector<16x7xf32>
    %325 = vector.broadcast %304 : vector<1x7xf32> to vector<16x7xf32>
    %326 = arith.addf %324, %325 : vector<16x7xf32>
    %c352 = arith.constant 352 : index
    %c0_116 = arith.constant 0 : index
    %327 = vector.load %arg4[%c352, %c0_116] : memref<592x32xf32, #tpu.memory_space<vmem>>, vector<7x3xf32>
    %cst_117 = arith.constant dense<0.000000e+00> : vector<16x3xf32>
    %328 = tpu.matmul %326, %327, %cst_117 {dimension_numbers = #tpu.dot_dimension_numbers<[1], [0], [0], [1], [0, 0, 1, 1], [], []>} : vector<16x7xf32>, vector<7x3xf32>, vector<16x3xf32> -> vector<16x3xf32>
    %c360 = arith.constant 360 : index
    %c0_118 = arith.constant 0 : index
    %329 = vector.load %arg4[%c360, %c0_118] : memref<592x32xf32, #tpu.memory_space<vmem>>, vector<1x3xf32>
    %330 = vector.broadcast %329 : vector<1x3xf32> to vector<16x3xf32>
    %331 = arith.addf %328, %330 : vector<16x3xf32>
    %cst_119 = arith.constant 0.000000e+00 : f32
    %332 = vector.broadcast %cst_119 : f32 to vector<16x3xf32>
    %333 = arith.maximumf %331, %332 : vector<16x3xf32>
    %c368 = arith.constant 368 : index
    %c0_120 = arith.constant 0 : index
    %334 = vector.load %arg4[%c368, %c0_120] : memref<592x32xf32, #tpu.memory_space<vmem>>, vector<3x7xf32>
    %cst_121 = arith.constant dense<0.000000e+00> : vector<16x7xf32>
    %335 = tpu.matmul %333, %334, %cst_121 {dimension_numbers = #tpu.dot_dimension_numbers<[1], [0], [0], [1], [0, 0, 1, 1], [], []>} : vector<16x3xf32>, vector<3x7xf32>, vector<16x7xf32> -> vector<16x7xf32>
    %c376 = arith.constant 376 : index
    %c0_122 = arith.constant 0 : index
    %336 = vector.load %arg4[%c376, %c0_122] : memref<592x32xf32, #tpu.memory_space<vmem>>, vector<1x7xf32>
    %337 = vector.broadcast %336 : vector<1x7xf32> to vector<16x7xf32>
    %338 = arith.addf %335, %337 : vector<16x7xf32>
    %cst_123 = arith.constant 0.000000e+00 : f32
    %339 = vector.broadcast %cst_123 : f32 to vector<16x7xf32>
    %340 = arith.maximumf %338, %339 : vector<16x7xf32>
    %341 = arith.addf %340, %326 : vector<16x7xf32>
    %c336 = arith.constant 336 : index
    %c0_124 = arith.constant 0 : index
    %342 = vector.load %arg4[%c336, %c0_124] : memref<592x32xf32, #tpu.memory_space<vmem>>, vector<1x7xf32>
    %c344 = arith.constant 344 : index
    %c0_125 = arith.constant 0 : index
    %343 = vector.load %arg4[%c344, %c0_125] : memref<592x32xf32, #tpu.memory_space<vmem>>, vector<1x7xf32>
    %cst_126 = arith.constant dense<0.000000e+00> : vector<16xf32>
    %344 = vector.multi_reduction <add>, %341, %cst_126 [1] : vector<16x7xf32> to vector<16xf32>
    %345 = vector.shape_cast %344 : vector<16xf32> to vector<16x1xf32>
    %cst_127 = arith.constant 7.000000e+00 : f32
    %346 = vector.broadcast %cst_127 : f32 to vector<16x1xf32>
    %347 = arith.divf %345, %346 : vector<16x1xf32>
    %348 = vector.broadcast %347 : vector<16x1xf32> to vector<16x7xf32>
    %349 = arith.subf %341, %348 : vector<16x7xf32>
    %350 = arith.mulf %349, %349 : vector<16x7xf32>
    %cst_128 = arith.constant dense<0.000000e+00> : vector<16xf32>
    %351 = vector.multi_reduction <add>, %350, %cst_128 [1] : vector<16x7xf32> to vector<16xf32>
    %352 = vector.shape_cast %351 : vector<16xf32> to vector<16x1xf32>
    %cst_129 = arith.constant 7.000000e+00 : f32
    %353 = vector.broadcast %cst_129 : f32 to vector<16x1xf32>
    %354 = arith.divf %352, %353 : vector<16x1xf32>
    %355 = vector.broadcast %347 : vector<16x1xf32> to vector<16x7xf32>
    %356 = arith.subf %341, %355 : vector<16x7xf32>
    %cst_130 = arith.constant 9.99999974E-6 : f32
    %357 = vector.broadcast %cst_130 : f32 to vector<16x1xf32>
    %358 = arith.addf %354, %357 : vector<16x1xf32>
    %359 = math.rsqrt %358 : vector<16x1xf32>
    %360 = vector.broadcast %359 : vector<16x1xf32> to vector<16x7xf32>
    %361 = arith.mulf %356, %360 : vector<16x7xf32>
    %362 = vector.broadcast %342 : vector<1x7xf32> to vector<16x7xf32>
    %363 = arith.mulf %361, %362 : vector<16x7xf32>
    %364 = vector.broadcast %343 : vector<1x7xf32> to vector<16x7xf32>
    %365 = arith.addf %363, %364 : vector<16x7xf32>
    %c384 = arith.constant 384 : index
    %c0_131 = arith.constant 0 : index
    %366 = vector.load %arg4[%c384, %c0_131] : memref<592x32xf32, #tpu.memory_space<vmem>>, vector<7x21xf32>
    %cst_132 = arith.constant dense<0.000000e+00> : vector<16x21xf32>
    %367 = tpu.matmul %365, %366, %cst_132 {dimension_numbers = #tpu.dot_dimension_numbers<[1], [0], [0], [1], [0, 0, 1, 1], [], []>} : vector<16x7xf32>, vector<7x21xf32>, vector<16x21xf32> -> vector<16x21xf32>
    %c392 = arith.constant 392 : index
    %c0_133 = arith.constant 0 : index
    %368 = vector.load %arg4[%c392, %c0_133] : memref<592x32xf32, #tpu.memory_space<vmem>>, vector<1x21xf32>
    %369 = vector.broadcast %368 : vector<1x21xf32> to vector<16x21xf32>
    %370 = arith.addf %367, %369 : vector<16x21xf32>
    %371 = vector.extract_strided_slice %370 {offsets = [0, 0], sizes = [16, 7], strides = [1, 1]} : vector<16x21xf32> to vector<16x7xf32>
    %372 = vector.extract_strided_slice %370 {offsets = [0, 7], sizes = [16, 7], strides = [1, 1]} : vector<16x21xf32> to vector<16x7xf32>
    %373 = vector.extract_strided_slice %370 {offsets = [0, 14], sizes = [16, 7], strides = [1, 1]} : vector<16x21xf32> to vector<16x7xf32>
    %c400 = arith.constant 400 : index
    %c0_134 = arith.constant 0 : index
    %374 = vector.load %arg4[%c400, %c0_134] : memref<592x32xf32, #tpu.memory_space<vmem>>, vector<1x7xf32>
    %c408 = arith.constant 408 : index
    %c0_135 = arith.constant 0 : index
    %375 = vector.load %arg4[%c408, %c0_135] : memref<592x32xf32, #tpu.memory_space<vmem>>, vector<1x7xf32>
    %c416 = arith.constant 416 : index
    %c0_136 = arith.constant 0 : index
    %376 = vector.load %arg4[%c416, %c0_136] : memref<592x32xf32, #tpu.memory_space<vmem>>, vector<7x7xf32>
    %c424 = arith.constant 424 : index
    %c0_137 = arith.constant 0 : index
    %377 = vector.load %arg4[%c424, %c0_137] : memref<592x32xf32, #tpu.memory_space<vmem>>, vector<1x7xf32>
    %cst_138 = arith.constant dense<0.000000e+00> : vector<16x16xf32>
    %378 = tpu.matmul %371, %372, %cst_138 {dimension_numbers = #tpu.dot_dimension_numbers<[1], [1], [0], [0], [0, 0, 1, 0], [], []>} : vector<16x7xf32>, vector<16x7xf32>, vector<16x16xf32> -> vector<16x16xf32>
    %cst_139 = arith.constant 0.377964467 : f32
    %379 = vector.broadcast %cst_139 : f32 to vector<16x16xf32>
    %380 = arith.mulf %378, %379 : vector<16x16xf32>
    %381 = arith.addf %380, %2 : vector<16x16xf32>
    %382 = vector.broadcast %374 : vector<1x7xf32> to vector<16x7xf32>
    %383 = arith.mulf %371, %382 : vector<16x7xf32>
    %cst_140 = arith.constant dense<0.000000e+00> : vector<16xf32>
    %384 = vector.multi_reduction <add>, %383, %cst_140 [1] : vector<16x7xf32> to vector<16xf32>
    %385 = vector.shape_cast %384 : vector<16xf32> to vector<16x1xf32>
    %cst_141 = arith.constant 0.377964467 : f32
    %386 = vector.broadcast %cst_141 : f32 to vector<16x1xf32>
    %387 = arith.mulf %385, %386 : vector<16x1xf32>
    %cst_142 = arith.constant dense<0xFF800000> : vector<16xf32>
    %388 = vector.multi_reduction <maximumf>, %381, %cst_142 [1] : vector<16x16xf32> to vector<16xf32>
    %389 = vector.shape_cast %388 : vector<16xf32> to vector<16x1xf32>
    %390 = arith.maximumf %389, %387 : vector<16x1xf32>
    %391 = vector.broadcast %390 : vector<16x1xf32> to vector<16x16xf32>
    %392 = arith.subf %381, %391 : vector<16x16xf32>
    %393 = math.exp %392 : vector<16x16xf32>
    %394 = arith.subf %387, %390 : vector<16x1xf32>
    %395 = math.exp %394 : vector<16x1xf32>
    %cst_143 = arith.constant dense<0.000000e+00> : vector<16xf32>
    %396 = vector.multi_reduction <add>, %393, %cst_143 [1] : vector<16x16xf32> to vector<16xf32>
    %397 = vector.shape_cast %396 : vector<16xf32> to vector<16x1xf32>
    %398 = arith.addf %397, %395 : vector<16x1xf32>
    %cst_144 = arith.constant dense<0.000000e+00> : vector<16x7xf32>
    %399 = tpu.matmul %393, %373, %cst_144 {dimension_numbers = #tpu.dot_dimension_numbers<[1], [0], [0], [1], [0, 0, 1, 1], [], []>} : vector<16x16xf32>, vector<16x7xf32>, vector<16x7xf32> -> vector<16x7xf32>
    %400 = vector.broadcast %395 : vector<16x1xf32> to vector<16x7xf32>
    %401 = vector.broadcast %375 : vector<1x7xf32> to vector<16x7xf32>
    %402 = arith.mulf %400, %401 : vector<16x7xf32>
    %403 = arith.addf %399, %402 : vector<16x7xf32>
    %404 = tpu.reciprocal %398 : vector<16x1xf32> -> vector<16x1xf32>
    %405 = vector.broadcast %404 : vector<16x1xf32> to vector<16x7xf32>
    %406 = arith.mulf %403, %405 : vector<16x7xf32>
    %cst_145 = arith.constant dense<0.000000e+00> : vector<16x7xf32>
    %407 = tpu.matmul %406, %376, %cst_145 {dimension_numbers = #tpu.dot_dimension_numbers<[1], [0], [0], [1], [0, 0, 1, 1], [], []>} : vector<16x7xf32>, vector<7x7xf32>, vector<16x7xf32> -> vector<16x7xf32>
    %408 = vector.broadcast %377 : vector<1x7xf32> to vector<16x7xf32>
    %409 = arith.addf %407, %408 : vector<16x7xf32>
    %410 = arith.addf %409, %365 : vector<16x7xf32>
    %c496 = arith.constant 496 : index
    %c0_146 = arith.constant 0 : index
    %411 = vector.load %arg4[%c496, %c0_146] : memref<592x32xf32, #tpu.memory_space<vmem>>, vector<1x7xf32>
    %c504 = arith.constant 504 : index
    %c0_147 = arith.constant 0 : index
    %412 = vector.load %arg4[%c504, %c0_147] : memref<592x32xf32, #tpu.memory_space<vmem>>, vector<1x7xf32>
    %cst_148 = arith.constant dense<0.000000e+00> : vector<16xf32>
    %413 = vector.multi_reduction <add>, %410, %cst_148 [1] : vector<16x7xf32> to vector<16xf32>
    %414 = vector.shape_cast %413 : vector<16xf32> to vector<16x1xf32>
    %cst_149 = arith.constant 7.000000e+00 : f32
    %415 = vector.broadcast %cst_149 : f32 to vector<16x1xf32>
    %416 = arith.divf %414, %415 : vector<16x1xf32>
    %417 = vector.broadcast %416 : vector<16x1xf32> to vector<16x7xf32>
    %418 = arith.subf %410, %417 : vector<16x7xf32>
    %419 = arith.mulf %418, %418 : vector<16x7xf32>
    %cst_150 = arith.constant dense<0.000000e+00> : vector<16xf32>
    %420 = vector.multi_reduction <add>, %419, %cst_150 [1] : vector<16x7xf32> to vector<16xf32>
    %421 = vector.shape_cast %420 : vector<16xf32> to vector<16x1xf32>
    %cst_151 = arith.constant 7.000000e+00 : f32
    %422 = vector.broadcast %cst_151 : f32 to vector<16x1xf32>
    %423 = arith.divf %421, %422 : vector<16x1xf32>
    %424 = vector.broadcast %416 : vector<16x1xf32> to vector<16x7xf32>
    %425 = arith.subf %410, %424 : vector<16x7xf32>
    %cst_152 = arith.constant 9.99999974E-6 : f32
    %426 = vector.broadcast %cst_152 : f32 to vector<16x1xf32>
    %427 = arith.addf %423, %426 : vector<16x1xf32>
    %428 = math.rsqrt %427 : vector<16x1xf32>
    %429 = vector.broadcast %428 : vector<16x1xf32> to vector<16x7xf32>
    %430 = arith.mulf %425, %429 : vector<16x7xf32>
    %431 = vector.broadcast %411 : vector<1x7xf32> to vector<16x7xf32>
    %432 = arith.mulf %430, %431 : vector<16x7xf32>
    %433 = vector.broadcast %412 : vector<1x7xf32> to vector<16x7xf32>
    %434 = arith.addf %432, %433 : vector<16x7xf32>
    %c432 = arith.constant 432 : index
    %c0_153 = arith.constant 0 : index
    %435 = vector.load %arg4[%c432, %c0_153] : memref<592x32xf32, #tpu.memory_space<vmem>>, vector<7x7xf32>
    %cst_154 = arith.constant dense<0.000000e+00> : vector<16x7xf32>
    %436 = tpu.matmul %434, %435, %cst_154 {dimension_numbers = #tpu.dot_dimension_numbers<[1], [0], [0], [1], [0, 0, 1, 1], [], []>} : vector<16x7xf32>, vector<7x7xf32>, vector<16x7xf32> -> vector<16x7xf32>
    %c440 = arith.constant 440 : index
    %c0_155 = arith.constant 0 : index
    %437 = vector.load %arg4[%c440, %c0_155] : memref<592x32xf32, #tpu.memory_space<vmem>>, vector<1x7xf32>
    %438 = vector.broadcast %437 : vector<1x7xf32> to vector<16x7xf32>
    %439 = arith.addf %436, %438 : vector<16x7xf32>
    %c448 = arith.constant 448 : index
    %c0_156 = arith.constant 0 : index
    %440 = vector.load %arg4[%c448, %c0_156] : memref<592x32xf32, #tpu.memory_space<vmem>>, vector<6x14xf32>
    %cst_157 = arith.constant dense<0.000000e+00> : vector<10x14xf32>
    %441 = tpu.matmul %1, %440, %cst_157 {dimension_numbers = #tpu.dot_dimension_numbers<[1], [0], [0], [1], [0, 0, 1, 1], [], []>} : vector<10x6xf32>, vector<6x14xf32>, vector<10x14xf32> -> vector<10x14xf32>
    %c456 = arith.constant 456 : index
    %c0_158 = arith.constant 0 : index
    %442 = vector.load %arg4[%c456, %c0_158] : memref<592x32xf32, #tpu.memory_space<vmem>>, vector<1x14xf32>
    %443 = vector.broadcast %442 : vector<1x14xf32> to vector<10x14xf32>
    %444 = arith.addf %441, %443 : vector<10x14xf32>
    %445 = vector.extract_strided_slice %444 {offsets = [0, 0], sizes = [10, 7], strides = [1, 1]} : vector<10x14xf32> to vector<10x7xf32>
    %446 = vector.extract_strided_slice %444 {offsets = [0, 7], sizes = [10, 7], strides = [1, 1]} : vector<10x14xf32> to vector<10x7xf32>
    %c464 = arith.constant 464 : index
    %c0_159 = arith.constant 0 : index
    %447 = vector.load %arg4[%c464, %c0_159] : memref<592x32xf32, #tpu.memory_space<vmem>>, vector<1x7xf32>
    %c472 = arith.constant 472 : index
    %c0_160 = arith.constant 0 : index
    %448 = vector.load %arg4[%c472, %c0_160] : memref<592x32xf32, #tpu.memory_space<vmem>>, vector<1x7xf32>
    %c480 = arith.constant 480 : index
    %c0_161 = arith.constant 0 : index
    %449 = vector.load %arg4[%c480, %c0_161] : memref<592x32xf32, #tpu.memory_space<vmem>>, vector<7x7xf32>
    %c488 = arith.constant 488 : index
    %c0_162 = arith.constant 0 : index
    %450 = vector.load %arg4[%c488, %c0_162] : memref<592x32xf32, #tpu.memory_space<vmem>>, vector<1x7xf32>
    %cst_163 = arith.constant dense<0.000000e+00> : vector<16x10xf32>
    %451 = tpu.matmul %439, %445, %cst_163 {dimension_numbers = #tpu.dot_dimension_numbers<[1], [1], [0], [0], [0, 0, 1, 0], [], []>} : vector<16x7xf32>, vector<10x7xf32>, vector<16x10xf32> -> vector<16x10xf32>
    %cst_164 = arith.constant 0.377964467 : f32
    %452 = vector.broadcast %cst_164 : f32 to vector<16x10xf32>
    %453 = arith.mulf %451, %452 : vector<16x10xf32>
    %454 = arith.addf %453, %3 : vector<16x10xf32>
    %455 = vector.broadcast %447 : vector<1x7xf32> to vector<16x7xf32>
    %456 = arith.mulf %439, %455 : vector<16x7xf32>
    %cst_165 = arith.constant dense<0.000000e+00> : vector<16xf32>
    %457 = vector.multi_reduction <add>, %456, %cst_165 [1] : vector<16x7xf32> to vector<16xf32>
    %458 = vector.shape_cast %457 : vector<16xf32> to vector<16x1xf32>
    %cst_166 = arith.constant 0.377964467 : f32
    %459 = vector.broadcast %cst_166 : f32 to vector<16x1xf32>
    %460 = arith.mulf %458, %459 : vector<16x1xf32>
    %cst_167 = arith.constant dense<0xFF800000> : vector<16xf32>
    %461 = vector.multi_reduction <maximumf>, %454, %cst_167 [1] : vector<16x10xf32> to vector<16xf32>
    %462 = vector.shape_cast %461 : vector<16xf32> to vector<16x1xf32>
    %463 = arith.maximumf %462, %460 : vector<16x1xf32>
    %464 = vector.broadcast %463 : vector<16x1xf32> to vector<16x10xf32>
    %465 = arith.subf %454, %464 : vector<16x10xf32>
    %466 = math.exp %465 : vector<16x10xf32>
    %467 = arith.subf %460, %463 : vector<16x1xf32>
    %468 = math.exp %467 : vector<16x1xf32>
    %cst_168 = arith.constant dense<0.000000e+00> : vector<16xf32>
    %469 = vector.multi_reduction <add>, %466, %cst_168 [1] : vector<16x10xf32> to vector<16xf32>
    %470 = vector.shape_cast %469 : vector<16xf32> to vector<16x1xf32>
    %471 = arith.addf %470, %468 : vector<16x1xf32>
    %cst_169 = arith.constant dense<0.000000e+00> : vector<16x7xf32>
    %472 = tpu.matmul %466, %446, %cst_169 {dimension_numbers = #tpu.dot_dimension_numbers<[1], [0], [0], [1], [0, 0, 1, 1], [], []>} : vector<16x10xf32>, vector<10x7xf32>, vector<16x7xf32> -> vector<16x7xf32>
    %473 = vector.broadcast %468 : vector<16x1xf32> to vector<16x7xf32>
    %474 = vector.broadcast %448 : vector<1x7xf32> to vector<16x7xf32>
    %475 = arith.mulf %473, %474 : vector<16x7xf32>
    %476 = arith.addf %472, %475 : vector<16x7xf32>
    %477 = tpu.reciprocal %471 : vector<16x1xf32> -> vector<16x1xf32>
    %478 = vector.broadcast %477 : vector<16x1xf32> to vector<16x7xf32>
    %479 = arith.mulf %476, %478 : vector<16x7xf32>
    %cst_170 = arith.constant dense<0.000000e+00> : vector<16x7xf32>
    %480 = tpu.matmul %479, %449, %cst_170 {dimension_numbers = #tpu.dot_dimension_numbers<[1], [0], [0], [1], [0, 0, 1, 1], [], []>} : vector<16x7xf32>, vector<7x7xf32>, vector<16x7xf32> -> vector<16x7xf32>
    %481 = vector.broadcast %450 : vector<1x7xf32> to vector<16x7xf32>
    %482 = arith.addf %480, %481 : vector<16x7xf32>
    %483 = arith.addf %482, %434 : vector<16x7xf32>
    %c512 = arith.constant 512 : index
    %c0_171 = arith.constant 0 : index
    %484 = vector.load %arg4[%c512, %c0_171] : memref<592x32xf32, #tpu.memory_space<vmem>>, vector<1x7xf32>
    %c520 = arith.constant 520 : index
    %c0_172 = arith.constant 0 : index
    %485 = vector.load %arg4[%c520, %c0_172] : memref<592x32xf32, #tpu.memory_space<vmem>>, vector<1x7xf32>
    %cst_173 = arith.constant dense<0.000000e+00> : vector<16xf32>
    %486 = vector.multi_reduction <add>, %483, %cst_173 [1] : vector<16x7xf32> to vector<16xf32>
    %487 = vector.shape_cast %486 : vector<16xf32> to vector<16x1xf32>
    %cst_174 = arith.constant 7.000000e+00 : f32
    %488 = vector.broadcast %cst_174 : f32 to vector<16x1xf32>
    %489 = arith.divf %487, %488 : vector<16x1xf32>
    %490 = vector.broadcast %489 : vector<16x1xf32> to vector<16x7xf32>
    %491 = arith.subf %483, %490 : vector<16x7xf32>
    %492 = arith.mulf %491, %491 : vector<16x7xf32>
    %cst_175 = arith.constant dense<0.000000e+00> : vector<16xf32>
    %493 = vector.multi_reduction <add>, %492, %cst_175 [1] : vector<16x7xf32> to vector<16xf32>
    %494 = vector.shape_cast %493 : vector<16xf32> to vector<16x1xf32>
    %cst_176 = arith.constant 7.000000e+00 : f32
    %495 = vector.broadcast %cst_176 : f32 to vector<16x1xf32>
    %496 = arith.divf %494, %495 : vector<16x1xf32>
    %497 = vector.broadcast %489 : vector<16x1xf32> to vector<16x7xf32>
    %498 = arith.subf %483, %497 : vector<16x7xf32>
    %cst_177 = arith.constant 9.99999974E-6 : f32
    %499 = vector.broadcast %cst_177 : f32 to vector<16x1xf32>
    %500 = arith.addf %496, %499 : vector<16x1xf32>
    %501 = math.rsqrt %500 : vector<16x1xf32>
    %502 = vector.broadcast %501 : vector<16x1xf32> to vector<16x7xf32>
    %503 = arith.mulf %498, %502 : vector<16x7xf32>
    %504 = vector.broadcast %484 : vector<1x7xf32> to vector<16x7xf32>
    %505 = arith.mulf %503, %504 : vector<16x7xf32>
    %506 = vector.broadcast %485 : vector<1x7xf32> to vector<16x7xf32>
    %507 = arith.addf %505, %506 : vector<16x7xf32>
    %c544 = arith.constant 544 : index
    %c0_178 = arith.constant 0 : index
    %508 = vector.load %arg4[%c544, %c0_178] : memref<592x32xf32, #tpu.memory_space<vmem>>, vector<7x3xf32>
    %cst_179 = arith.constant dense<0.000000e+00> : vector<16x3xf32>
    %509 = tpu.matmul %507, %508, %cst_179 {dimension_numbers = #tpu.dot_dimension_numbers<[1], [0], [0], [1], [0, 0, 1, 1], [], []>} : vector<16x7xf32>, vector<7x3xf32>, vector<16x3xf32> -> vector<16x3xf32>
    %c552 = arith.constant 552 : index
    %c0_180 = arith.constant 0 : index
    %510 = vector.load %arg4[%c552, %c0_180] : memref<592x32xf32, #tpu.memory_space<vmem>>, vector<1x3xf32>
    %511 = vector.broadcast %510 : vector<1x3xf32> to vector<16x3xf32>
    %512 = arith.addf %509, %511 : vector<16x3xf32>
    %cst_181 = arith.constant 0.000000e+00 : f32
    %513 = vector.broadcast %cst_181 : f32 to vector<16x3xf32>
    %514 = arith.maximumf %512, %513 : vector<16x3xf32>
    %c560 = arith.constant 560 : index
    %c0_182 = arith.constant 0 : index
    %515 = vector.load %arg4[%c560, %c0_182] : memref<592x32xf32, #tpu.memory_space<vmem>>, vector<3x7xf32>
    %cst_183 = arith.constant dense<0.000000e+00> : vector<16x7xf32>
    %516 = tpu.matmul %514, %515, %cst_183 {dimension_numbers = #tpu.dot_dimension_numbers<[1], [0], [0], [1], [0, 0, 1, 1], [], []>} : vector<16x3xf32>, vector<3x7xf32>, vector<16x7xf32> -> vector<16x7xf32>
    %c568 = arith.constant 568 : index
    %c0_184 = arith.constant 0 : index
    %517 = vector.load %arg4[%c568, %c0_184] : memref<592x32xf32, #tpu.memory_space<vmem>>, vector<1x7xf32>
    %518 = vector.broadcast %517 : vector<1x7xf32> to vector<16x7xf32>
    %519 = arith.addf %516, %518 : vector<16x7xf32>
    %cst_185 = arith.constant 0.000000e+00 : f32
    %520 = vector.broadcast %cst_185 : f32 to vector<16x7xf32>
    %521 = arith.maximumf %519, %520 : vector<16x7xf32>
    %522 = arith.addf %521, %507 : vector<16x7xf32>
    %c528 = arith.constant 528 : index
    %c0_186 = arith.constant 0 : index
    %523 = vector.load %arg4[%c528, %c0_186] : memref<592x32xf32, #tpu.memory_space<vmem>>, vector<1x7xf32>
    %c536 = arith.constant 536 : index
    %c0_187 = arith.constant 0 : index
    %524 = vector.load %arg4[%c536, %c0_187] : memref<592x32xf32, #tpu.memory_space<vmem>>, vector<1x7xf32>
    %cst_188 = arith.constant dense<0.000000e+00> : vector<16xf32>
    %525 = vector.multi_reduction <add>, %522, %cst_188 [1] : vector<16x7xf32> to vector<16xf32>
    %526 = vector.shape_cast %525 : vector<16xf32> to vector<16x1xf32>
    %cst_189 = arith.constant 7.000000e+00 : f32
    %527 = vector.broadcast %cst_189 : f32 to vector<16x1xf32>
    %528 = arith.divf %526, %527 : vector<16x1xf32>
    %529 = vector.broadcast %528 : vector<16x1xf32> to vector<16x7xf32>
    %530 = arith.subf %522, %529 : vector<16x7xf32>
    %531 = arith.mulf %530, %530 : vector<16x7xf32>
    %cst_190 = arith.constant dense<0.000000e+00> : vector<16xf32>
    %532 = vector.multi_reduction <add>, %531, %cst_190 [1] : vector<16x7xf32> to vector<16xf32>
    %533 = vector.shape_cast %532 : vector<16xf32> to vector<16x1xf32>
    %cst_191 = arith.constant 7.000000e+00 : f32
    %534 = vector.broadcast %cst_191 : f32 to vector<16x1xf32>
    %535 = arith.divf %533, %534 : vector<16x1xf32>
    %536 = vector.broadcast %528 : vector<16x1xf32> to vector<16x7xf32>
    %537 = arith.subf %522, %536 : vector<16x7xf32>
    %cst_192 = arith.constant 9.99999974E-6 : f32
    %538 = vector.broadcast %cst_192 : f32 to vector<16x1xf32>
    %539 = arith.addf %535, %538 : vector<16x1xf32>
    %540 = math.rsqrt %539 : vector<16x1xf32>
    %541 = vector.broadcast %540 : vector<16x1xf32> to vector<16x7xf32>
    %542 = arith.mulf %537, %541 : vector<16x7xf32>
    %543 = vector.broadcast %523 : vector<1x7xf32> to vector<16x7xf32>
    %544 = arith.mulf %542, %543 : vector<16x7xf32>
    %545 = vector.broadcast %524 : vector<1x7xf32> to vector<16x7xf32>
    %546 = arith.addf %544, %545 : vector<16x7xf32>
    %c0_193 = arith.constant 0 : index
    %c0_194 = arith.constant 0 : index
    %547 = vector.load %arg5[%c0_193, %c0_194] : memref<16x7xf32, #tpu.memory_space<vmem>>, vector<16x7xf32>
    tpu.vector_store %arg5[%c0_193, %c0_194], %546 {strides = array<i32>} : memref<16x7xf32, #tpu.memory_space<vmem>>, vector<16x7xf32>,
    %c576 = arith.constant 576 : index
    %c0_195 = arith.constant 0 : index
    %548 = vector.load %arg4[%c576, %c0_195] : memref<592x32xf32, #tpu.memory_space<vmem>>, vector<7x10xf32>
    %cst_196 = arith.constant dense<0.000000e+00> : vector<16x10xf32>
    %549 = tpu.matmul %546, %548, %cst_196 {dimension_numbers = #tpu.dot_dimension_numbers<[1], [0], [0], [1], [0, 0, 1, 1], [], []>} : vector<16x7xf32>, vector<7x10xf32>, vector<16x10xf32> -> vector<16x10xf32>
    %c584 = arith.constant 584 : index
    %c0_197 = arith.constant 0 : index
    %550 = vector.load %arg4[%c584, %c0_197] : memref<592x32xf32, #tpu.memory_space<vmem>>, vector<1x10xf32>
    %551 = vector.broadcast %550 : vector<1x10xf32> to vector<16x10xf32>
    %552 = arith.addf %549, %551 : vector<16x10xf32>
    %c0_198 = arith.constant 0 : index
    %c0_199 = arith.constant 0 : index
    %553 = vector.load %arg6[%c0_198, %c0_199] : memref<16x10xf32, #tpu.memory_space<vmem>>, vector<16x10xf32>
    tpu.vector_store %arg6[%c0_198, %c0_199], %552 {strides = array<i32>} : memref<16x10xf32, #tpu.memory_space<vmem>>, vector<16x10xf32>,
    return
  }
}

</mosaic_0001>

<bundles_post_ra>
// kernel: eq.15
= control target key start
LH: loop header
LB: loop body
LE: loop exit
PB: predicated region body
PF: predicated region fallthrough
CT: control target
= control target key end

     0   :  { %vm8_vm0 = vcmask 64512   ;;  %vm14_vm1 = vcmask 130112   ;;  %s42_s0 = inlined_call_operand.vmem [shape: s32[2,8], index: 0, kind: input, shape index: {}]   ;;  %s43_s1 = inlined_call_operand.vmem [shape: s32[16], index: 1, kind: output, shape index: {}]  }
   0x1   :  { %v5_v0 = vld [vmem:[%s42_s0] sm:$0x3]  ;;  %s25_s0 = smov 8  }
   0x2   :  { %6 = vst [vmem:[#allocation1] sm:$0x3] %v5_v0 }
   0x9   :  { %v11_v1 = vld [vmem:[#allocation1 + $0x1] sm:$0x1]   ;;  %v7_v2 = vld [vmem:[#allocation1] sm:$0x1]  }
   0xa   :  { %12 = vrot.lane.b32.xlu0 %v11_v1, %s25_s0  ;;  %9 = vst.msk [vmem:[#allocation0] sm:$0x1] %vm8_vm0, %v7_v2  }
  0x7c   :  { %v13_v3 = vpop.permute.xlu0 %12  }
  0x7d   :  { %15 = vst.msk [vmem:[#allocation0] sm:$0x1] %vm14_vm1, %v13_v3  }
  0x84   :  { %v20_v4 = vld [vmem:[#allocation0] sm:$0x1] }
  0x85   :  { %23 = vst [vmem:[%s43_s1] sm:$0x1] %v20_v4 }

// kernel: eq.25
= control target key start
LH: loop header
LB: loop body
LE: loop exit
PB: predicated region body
PF: predicated region fallthrough
CT: control target
= control target key end

     0   :  { %vm8_vm0 = vcmask 39936   ;;  %vm14_vm1 = vcmask 80936   ;;  %s42_s0 = inlined_call_operand.vmem [shape: s32[2,5], index: 0, kind: input, shape index: {}]   ;;  %s43_s1 = inlined_call_operand.vmem [shape: s32[10], index: 1, kind: output, shape index: {}]  }
   0x1   :  { %v5_v0 = vld [vmem:[%s42_s0] sm:$0x3]  ;;  %s25_s0 = smov 5  }
   0x2   :  { %6 = vst [vmem:[#allocation1] sm:$0x3] %v5_v0 }
   0x9   :  { %v11_v1 = vld [vmem:[#allocation1 + $0x1] sm:$0x1]   ;;  %v7_v2 = vld [vmem:[#allocation1] sm:$0x1]  }
   0xa   :  { %12 = vrot.lane.b32.xlu0 %v11_v1, %s25_s0  ;;  %9 = vst.msk [vmem:[#allocation0] sm:$0x1] %vm8_vm0, %v7_v2  }
  0x7c   :  { %v13_v3 = vpop.permute.xlu0 %12  }
  0x7d   :  { %15 = vst.msk [vmem:[#allocation0] sm:$0x1] %vm14_vm1, %v13_v3  }
  0x84   :  { %v20_v4 = vld [vmem:[#allocation0] sm:$0x1] }
  0x85   :  { %23 = vst [vmem:[%s43_s1] sm:$0x1] %v20_v4 }

// kernel: decoder_forward.1
= control target key start
LH: loop header
LB: loop body
LE: loop exit
PB: predicated region body
PF: predicated region fallthrough
CT: control target
= control target key end

     0   :  { %vm44_vm0 = vcmask 1046528   ;;  %vm37_vm1 = vcmask 56320   ;;  %s5051_s0 = inlined_call_operand.vmem [shape: f32[16,7], index: 0, kind: input, shape index: {}]   ;;  %s5052_s1 = inlined_call_operand.vmem [shape: f32[10,6], index: 1, kind: input, shape index: {}]   ;;  %s5053_s2 = inlined_call_operand.vmem [shape: f32[16,16], index: 2, kind: input, shape index: {}]   ;;  %s5054_s3 = inlined_call_operand.vmem [shape: f32[16,10], index: 3, kind: input, shape index: {}]   ;;  %s5055_s4 = inlined_call_operand.vmem [shape: f32[592,32], index: 4, kind: input, shape index: {}]   ;;  %s5056_s5 = inlined_call_operand.vmem [shape: f32[16,7], index: 5, kind: output, shape index: {0}]   ;;  %s5057_s6 = inlined_call_operand.hbm [shape: f32[16,10], index: 6, kind: output, shape index: {1}]  }
   0x1   :  { %v31_v0 = vld [vmem:[%s5055_s4] sm:$0x7f]  ;;  %v4481_v2 = vld [vmem:[%s5051_s0 + $0x8] sm:$0xff] }
   0x2   :  { %v4476_v1 = vld [vmem:[%s5051_s0] sm:$0xff]  ;;  %4095 = vmatprep.subr.msk.mxu0 %vm44_vm0, %v31_v0 }
   0x3   :  { %4097 = vmatprep.mubr.msk.f32.mxu0 %vm37_vm1, %v4476_v1 }
   0x4   :  { %12 = vsyncpa [#allocation3], 0  ;;  %4096 = vmatpush3.msk.msra.mxu0 %vm44_vm0, %v31_v0  ;;  %v3824_v3 = vld [vmem:[%s5055_s4 + $0x8] ss:$0 sm:$0xff]  ;;  %v3832_v5 = vld [vmem:[%s5055_s4 + $0x10] ss:$0 sm:$0xff] }
   0x5   :  { %4098 = vmatmul.mubr.msk.f32.vlgmr.msra.gmra.mxu0 %vm37_vm1, %v4481_v2  ;;  %s4430_s0 = smov 121   ;;  %v4508_v16 = vld [vmem:[%s5053_s2 + $0x8] sm:$0xff]  ;;  %vm234_vm2 = vcmask 130048   ;;  %v4513_v19 = vld [vmem:[%s5053_s2] sm:$0xff]  ;;  %s4431_s11 = smov 114   ;;  %vm594_vm3 = vcmask 1045504  }
   0x6   :  { %v125_v45 = vld [vmem:[%s5055_s4 + $0x20] sm:$0x7f]  ;;  %v3833_v54 = vld [vmem:[%s5055_s4 + $0x18] ss:$0 sm:$0xff]  ;;  %vm587_vm4 = vcmask 48128   ;;  %vm782_vm5 = vcmask 80896  }
   0x7   :  { %vm828_vm6 = vcmask 1041408   ;;  %vm1145_vm7 = vcmask 1042432   ;;  %vm1138_vm8 = vcmask 23552   ;;  %s4432_s28 = smov [#allocation2]  }
   0x8   :  { %s3811_s29 = sshll.u32 %s4432_s28, 4  ;;  %s3812_s29 = int_to_ptr.vmem [resolvable:$true] %s3811_s29 }
   0x9   :  { %p4413_p1 = scmp.lt.s32.totalorder %s3812_s29, %s3812_s29 }
  0xc5   :  { %v4099_v4 = vpop.f32.mrf.mxu0 }
  0xc6   :  { %v120_v6 = vadd.f32 %v4099_v4, %v3824_v3  ;;  %v3836_v4 = vld [vmem:[%s5055_s4 + $0x28] ss:$0 sm:$0xff] }
  0xc7   :  { %v114_v7 = vpop.f32.mrf.mxu0 }
  0xc8   :  { %v115_v8 = vadd.f32 %v3824_v3, %v114_v7  ;;  %131 = vrot.lane.b32.xlu0 %v120_v6, %s4430_s0  ;;  %v225_v9 = vmul.f32 %v3832_v5, %v120_v6 }
  0xca   :  { %4104 = vmatprep.mubr.msk.f32.mxu1 %vm37_vm1, %v115_v8  ;;  %v229_v10 = vsel %vm37_vm1, %v225_v9, 0.0  ;;  %v224_v11 = vmul.f32 %v3832_v5, %v115_v8 }
  0xcb   :  { %230 = vadd.xlane.f32.xlu1 %v229_v10 }
  0xcc   :  { %129 = vrot.lane.b32.xlu0 %v115_v8, %s4430_s0  ;;  %v226_v12 = vsel %vm37_vm1, %v224_v11, 0.0 }
  0xcf   :  { %227 = vadd.xlane.f32.xlu1 %v226_v12 }
 0x13a   :  { %v132_v13 = vpop.permute.xlu0 %131 }
 0x13b   :  { %4100 = vmatprep.subr.msk.mxu1 %vm37_vm1, %v132_v13 }
 0x13c   :  { %4101 = vmatpush3.xpose.msk.msra.mxu1 %vm37_vm1, %v132_v13 }
 0x13e   :  { %v130_v14 = vpop.permute.xlu0 %129 }
 0x13f   :  { %4102 = vmatprep.subr.msk.mxu1 %vm37_vm1, %v130_v14 }
 0x140   :  { %4103 = vmatpush3.xpose.msk.msra.mxu1 %vm37_vm1, %v130_v14 }
 0x143   :  { %4105 = vmatmul.mubr.msk.f32.vlgmr.msra.gmra.mxu1 %vm37_vm1, %v120_v6 }
 0x154   :  { %v231_v25 = vpop.xlane.xlu1 %230 }
 0x155   :  { %v233_v27 = vmul.f32 0.37796447, %v231_v25  ;;  %v491_v25 = vld [vmem:[%s5055_s4 + $0x30] sm:$0x7f] }
 0x156   :  { %4119 = vmatprep.subr.msk.mxu1 %vm44_vm0, %v491_v25 }
 0x157   :  { %4120 = vmatpush3.msk.msra.mxu1 %vm44_vm0, %v491_v25 }
 0x158   :  { %v228_v26 = vpop.xlane.xlu1 %227 }
 0x159   :  { %v232_v29 = vmul.f32 0.37796447, %v228_v26 }
 0x203   :  { %v4106_v15 = vpop.f32.mrf.mxu1 }
 0x204   :  { %v217_v17 = vmul.f32 0.37796447, %v4106_v15 }
 0x205   :  { %v207_v18 = vpop.f32.mrf.mxu1 }
 0x206   :  { %v216_v20 = vmul.f32 0.37796447, %v207_v18  ;;  %v219_v21 = vadd.f32 %v217_v17, %v4508_v16 }
 0x208   :  { %v238_v22 = vsel %vm234_vm2, %v219_v21, -inf  ;;  %v218_v23 = vadd.f32 %v216_v20, %v4513_v19 }
 0x209   :  { %239 = vmax.xlane.f32.xlu1 %v238_v22 }
 0x20a   :  { %v235_v24 = vsel %vm234_vm2, %v218_v23, -inf }
 0x20b   :  { %236 = vmax.xlane.f32.xlu0 %v235_v24  ;;  %v4558_v24 = vld [vmem:[%s5052_s1 + $0x8] sm:$0x3] }
 0x21a   :  { %271 = vrot.lane.b32.xlu1 %v120_v6, %s4431_s11 }
 0x21e   :  { %269 = vrot.lane.b32.xlu1 %v115_v8, %s4431_s11 }
 0x292   :  { %v240_v28 = vpop.xlane.xlu1 %239 }
 0x293   :  { %v242_v30 = vmax.f32 %v240_v28, %v233_v27 }
 0x294   :  { %v237_v31 = vpop.xlane.xlu0 %236 }
 0x295   :  { %v244_v32 = vsub.f32 %v219_v21, %v242_v30  ;;  %v250_v33 = vsub.f32 %v233_v27, %v242_v30  ;;  %v241_v34 = vmax.f32 %v237_v31, %v232_v29 }
 0x296   :  { %v272_v35 = vpop.permute.xlu1 %271 }
 0x297   :  { %v247_v36 = vmul.f32 1.442695, %v244_v32  ;;  %v243_v37 = vsub.f32 %v218_v23, %v241_v34  ;;  %v249_v38 = vsub.f32 %v232_v29, %v241_v34  ;;  %4107 = vmatprep.subr.mxu0 %v272_v35  ;;  %v253_v47 = vmul.f32 1.442695, %v250_v33  ;;  %v4550_v23 = vld [vmem:[%s5052_s1] sm:$0xff] }
 0x298   :  { %4108 = vmatpush3.msra.mxu0 %v272_v35  ;;  %v3840_v33 = vld [vmem:[%s5055_s4 + $0x70] ss:$0 sm:$0xff]  ;;  %v3841_v35 = vld [vmem:[%s5055_s4 + $0x78] ss:$0 sm:$0xff] }
 0x299   :  { %4294 = vpow2.f32 %v247_v36  ;;  %v245_v39 = vmul.f32 1.442695, %v243_v37  ;;  %v251_v46 = vmul.f32 1.442695, %v249_v38 }
 0x29a   :  { %v270_v40 = vpop.permute.xlu1 %269 }
 0x29b   :  { %4296 = vpow2.f32 %v245_v39  ;;  %4109 = vmatprep.subr.mxu0 %v270_v40 }
 0x29c   :  { %4110 = vmatpush3.msra.mxu0 %v270_v40  ;;  %4298 = vpow2.f32 %v251_v46 }
 0x29d   :  { %4114 = vmatprep.subr.msk.mxu0 %vm44_vm0, %v125_v45  ;;  %4300 = vpow2.f32 %v253_v47  ;;  %v3842_v47 = vld [vmem:[%s5055_s4 + $0x38] ss:$0 sm:$0xff] }
 0x2a6   :  { %v4295_v41 = vpop.eup %4294 }
 0x2a7   :  { %v258_v42 = vsel %vm234_vm2, %v4295_v41, 0.0 }
 0x2a8   :  { %v4297_v43 = vpop.eup %4296  ;;  %259 = vadd.xlane.f32.xlu0 %v258_v42  ;;  %v3846_v42 = vld [vmem:[%s5055_s4 + $0x48] ss:$0 sm:$0xff] }
 0x2a9   :  { %4111 = vmatprep.mubr.msk.f32.mxu0 %vm234_vm2, %v4297_v43  ;;  %v255_v44 = vsel %vm234_vm2, %v4297_v43, 0.0  ;;  %v4299_v50 = vpop.eup %4298 }
 0x2aa   :  { %4112 = vmatmul.mubr.msk.f32.vlgmr.msra.gmra.mxu0 %vm234_vm2, %v4295_v41  ;;  %256 = vadd.xlane.f32.xlu1 %v255_v44  ;;  %v4301_v51 = vpop.eup %4300  ;;  %v267_v57 = vmul.f32 %v4299_v50, %v3833_v54 }
 0x2ab   :  { %4115 = vmatpush3.msk.msra.mxu0 %vm44_vm0, %v125_v45  ;;  %v268_v55 = vmul.f32 %v4301_v51, %v3833_v54 }
 0x331   :  { %v260_v49 = vpop.xlane.xlu0 %259 }
 0x332   :  { %v262_v53 = vadd.f32 %v4301_v51, %v260_v49  ;;  %v3854_v49 = vld [vmem:[%s5055_s4 + $0x50] ss:$0 sm:$0xff] }
 0x333   :  { %v257_v48 = vpop.xlane.xlu1 %256 }
 0x334   :  { %v261_v52 = vadd.f32 %v4299_v50, %v257_v48 }
 0x336   :  { %4302 = vrcp.f32 %v261_v52 }
 0x337   :  { %4304 = vrcp.f32 %v262_v53 }
 0x343   :  { %v4303_v61 = vpop.eup %4302 }
 0x344   :  { %v4305_v62 = vpop.eup %4304 }
 0x36a   :  { %v4113_v56 = vpop.f32.mrf.mxu0 }
 0x36b   :  { %v353_v58 = vadd.f32 %v4113_v56, %v268_v55 }
 0x36c   :  { %v347_v59 = vpop.f32.mrf.mxu0 }
 0x36d   :  { %v348_v60 = vadd.f32 %v347_v59, %v267_v57  ;;  %v359_v0 = vmul.f32 %v4305_v62, %v353_v58  ;;  %v4602_v58 = vld [vmem:[%s5054_s3 + $0x8] sm:$0xff] }
 0x36f   :  { %v358_v63 = vmul.f32 %v4303_v61, %v348_v60  ;;  %v4607_v61 = vld [vmem:[%s5054_s3] sm:$0xff] }
 0x371   :  { %4116 = vmatprep.mubr.msk.f32.mxu0 %vm37_vm1, %v358_v63 }
 0x372   :  { %4117 = vmatmul.mubr.msk.f32.vlgmr.msra.gmra.mxu0 %vm37_vm1, %v359_v0 }
 0x373   :  { %4126 = vmatprep.mubr.msk.f32.mxu0 %vm587_vm4, %v4550_v23 }
 0x432   :  { %v4118_v3 = vpop.f32.mrf.mxu0 }
 0x433   :  { %v445_v6 = vadd.f32 %v4118_v3, %v3836_v4 }
 0x434   :  { %v439_v5 = vpop.f32.mrf.mxu0 }
 0x435   :  { %v440_v7 = vadd.f32 %v3836_v4, %v439_v5  ;;  %v449_v10 = vadd.f32 %v445_v6, %v4481_v2  ;;  %v581_v2 = vld [vmem:[%s5055_s4 + $0x40] sm:$0x3f] }
 0x436   :  { %4124 = vmatprep.subr.msk.mxu0 %vm594_vm3, %v581_v2 }
 0x437   :  { %v448_v8 = vadd.f32 %v440_v7, %v4476_v1  ;;  %v455_v11 = vsel %vm37_vm1, %v449_v10, 0.0  ;;  %4125 = vmatpush3.msk.msra.mxu0 %vm594_vm3, %v581_v2 }
 0x438   :  { %4127 = vmatmul.mubr.msk.f32.vlgmr.msra.gmra.mxu0 %vm587_vm4, %v4558_v24 }
 0x439   :  { %v452_v9 = vsel %vm37_vm1, %v448_v8, 0.0 }
 0x43a   :  { %453 = vadd.xlane.f32.xlu0 %v452_v9 }
 0x43e   :  { %456 = vadd.xlane.f32.xlu0 %v455_v11 }
 0x4c3   :  { %v454_v12 = vpop.xlane.xlu0 %453 }
 0x4c4   :  { %v459_v13 = vmul.f32 0.14285715, %v454_v12 }
 0x4c6   :  { %v461_v14 = vsub.f32 %v448_v8, %v459_v13 }
 0x4c7   :  { %v457_v15 = vpop.xlane.xlu0 %456 }
 0x4c8   :  { %v460_v17 = vmul.f32 0.14285715, %v457_v15  ;;  %v463_v18 = vmul.f32 %v461_v14, %v461_v14 }
 0x4ca   :  { %v462_v20 = vsub.f32 %v449_v10, %v460_v17  ;;  %v465_v21 = vsel %vm37_vm1, %v463_v18, 0.0 }
 0x4cb   :  { %466 = vadd.xlane.f32.xlu0 %v465_v21 }
 0x4cc   :  { %v464_v22 = vmul.f32 %v462_v20, %v462_v20 }
 0x4ce   :  { %v468_v1 = vsel %vm37_vm1, %v464_v22, 0.0 }
 0x4cf   :  { %469 = vadd.xlane.f32.xlu0 %v468_v1 }
 0x4f8   :  { %v4128_v43 = vpop.f32.mrf.mxu0 }
 0x4f9   :  { %v670_v44 = vadd.f32 %v4128_v43, %v3846_v42 }
 0x4fa   :  { %v664_v45 = vpop.f32.mrf.mxu0 }
 0x4fb   :  { %4129 = vmatprep.subr.msk.mxu1 %vm37_vm1, %v670_v44  ;;  %v665_v46 = vadd.f32 %v3846_v42, %v664_v45 }
 0x554   :  { %v467_v26 = vpop.xlane.xlu0 %466 }
 0x555   :  { %v471_v27 = vmul.f32 0.14285715, %v467_v26 }
 0x557   :  { %v473_v28 = vadd.f32 1e-05, %v471_v27  ;;  %v675_v27 = vld [vmem:[%s5055_s4 + $0x60] sm:$0x7f] }
 0x558   :  { %v470_v29 = vpop.xlane.xlu0 %469 }
 0x559   :  { %4306 = vrsqrt.f32 %v473_v28  ;;  %v472_v30 = vmul.f32 0.14285715, %v470_v29 }
 0x55b   :  { %v474_v31 = vadd.f32 1e-05, %v472_v30 }
 0x55d   :  { %4308 = vrsqrt.f32 %v474_v31 }
 0x566   :  { %v4307_v32 = vpop.eup %4306 }
 0x567   :  { %v477_v34 = vmul.f32 %v4307_v32, %v461_v14 }
 0x569   :  { %v483_v36 = vmul.f32 %v3840_v33, %v477_v34 }
 0x56a   :  { %v4309_v37 = vpop.eup %4308 }
 0x56b   :  { %v478_v38 = vmul.f32 %v4309_v37, %v462_v20  ;;  %v4574_v39 = vadd.f32 %v3841_v35, %v483_v36  ;;  %v3855_v36 = vld [vmem:[%s5055_s4 + $0x58] ss:$0 sm:$0xff] }
 0x56d   :  { %v484_v40 = vmul.f32 %v3840_v33, %v478_v38  ;;  %4121 = vmatprep.mubr.msk.f32.mxu1 %vm37_vm1, %v4574_v39 }
 0x56f   :  { %v4578_v41 = vadd.f32 %v3841_v35, %v484_v40 }
 0x571   :  { %4122 = vmatmul.mubr.msk.f32.vlgmr.msra.gmra.mxu1 %vm37_vm1, %v4578_v41 }
 0x572   :  { %4130 = vmatpush3.xpose.msk.msra.mxu1 %vm37_vm1, %v670_v44 }
 0x573   :  { %4131 = vmatprep.subr.msk.mxu1 %vm37_vm1, %v665_v46 }
 0x576   :  { %4132 = vmatpush3.xpose.msk.msra.mxu1 %vm37_vm1, %v665_v46 }
 0x631   :  { %v4123_v48 = vpop.f32.mrf.mxu1 }
 0x632   :  { %v578_v50 = vadd.f32 %v4123_v48, %v3842_v47 }
 0x633   :  { %v572_v51 = vpop.f32.mrf.mxu1 }
 0x634   :  { %v573_v52 = vadd.f32 %v3842_v47, %v572_v51  ;;  %v773_v53 = vmul.f32 %v3854_v49, %v578_v50 }
 0x636   :  { %4133 = vmatprep.mubr.msk.f32.mxu1 %vm37_vm1, %v573_v52  ;;  %v777_v54 = vsel %vm37_vm1, %v773_v53, 0.0  ;;  %v772_v55 = vmul.f32 %v3854_v49, %v573_v52  ;;  %v3859_v49 = vld [vmem:[%s5055_s4 + $0x68] ss:$0 sm:$0xff] }
 0x637   :  { %778 = vadd.xlane.f32.xlu0 %v777_v54  ;;  %4134 = vmatmul.mubr.msk.f32.vlgmr.msra.gmra.mxu1 %vm37_vm1, %v578_v50 }
 0x638   :  { %v774_v56 = vsel %vm37_vm1, %v772_v55, 0.0 }
 0x63b   :  { %775 = vadd.xlane.f32.xlu0 %v774_v56 }
 0x6c0   :  { %v779_v5 = vpop.xlane.xlu0 %778 }
 0x6c1   :  { %v781_v7 = vmul.f32 0.37796447, %v779_v5 }
 0x6c4   :  { %v776_v6 = vpop.xlane.xlu0 %775 }
 0x6c5   :  { %v780_v9 = vmul.f32 0.37796447, %v776_v6 }
 0x6f7   :  { %v4135_v57 = vpop.f32.mrf.mxu1 }
 0x6f8   :  { %v765_v59 = vmul.f32 0.37796447, %v4135_v57 }
 0x6f9   :  { %v755_v60 = vpop.f32.mrf.mxu1 }
 0x6fa   :  { %v764_v62 = vmul.f32 0.37796447, %v755_v60  ;;  %v767_v63 = vadd.f32 %v765_v59, %v4602_v58 }
 0x6fc   :  { %v786_v0 = vsel %vm782_vm5, %v767_v63, -inf  ;;  %v766_v3 = vadd.f32 %v764_v62, %v4607_v61 }
 0x6fd   :  { %787 = vmax.xlane.f32.xlu1 %v786_v0 }
 0x6fe   :  { %v783_v4 = vsel %vm782_vm5, %v766_v3, -inf }
 0x6ff   :  { %784 = vmax.xlane.f32.xlu0 %v783_v4 }
 0x70e   :  { %817 = vrot.lane.b32.xlu1 %v665_v46, %s4430_s0 }
 0x715   :  { %819 = vrot.lane.b32.xlu0 %v670_v44, %s4430_s0 }
 0x786   :  { %v788_v8 = vpop.xlane.xlu1 %787 }
 0x787   :  { %v790_v10 = vmax.f32 %v788_v8, %v781_v7 }
 0x788   :  { %v785_v11 = vpop.xlane.xlu0 %784 }
 0x789   :  { %v792_v12 = vsub.f32 %v767_v63, %v790_v10  ;;  %v798_v13 = vsub.f32 %v781_v7, %v790_v10  ;;  %v789_v14 = vmax.f32 %v785_v11, %v780_v9 }
 0x78a   :  { %v818_v22 = vpop.permute.xlu1 %817 }
 0x78b   :  { %v795_v15 = vmul.f32 1.442695, %v792_v12  ;;  %v791_v17 = vsub.f32 %v766_v3, %v789_v14  ;;  %v797_v18 = vsub.f32 %v780_v9, %v789_v14  ;;  %v801_v29 = vmul.f32 1.442695, %v798_v13  ;;  %v3863_v14 = vld [vmem:[%s5055_s4 + $0x80] ss:$0 sm:$0xff] }
 0x78c   :  { %v820_v20 = vpop.permute.xlu0 %819 }
 0x78d   :  { %4310 = vpow2.f32 %v795_v15  ;;  %v793_v21 = vmul.f32 1.442695, %v791_v17  ;;  %4136 = vmatprep.subr.msk.mxu0 %vm828_vm6, %v820_v20  ;;  %v799_v28 = vmul.f32 1.442695, %v797_v18 }
 0x78e   :  { %4137 = vmatpush3.msk.msra.mxu0 %vm828_vm6, %v820_v20 }
 0x78f   :  { %4312 = vpow2.f32 %v793_v21  ;;  %4138 = vmatprep.subr.mxu0 %v818_v22  ;;  %v3864_v21 = vld [vmem:[%s5055_s4 + $0x88] ss:$0 sm:$0xff] }
 0x790   :  { %4139 = vmatpush3.msra.mxu0 %v818_v22  ;;  %4314 = vpow2.f32 %v799_v28 }
 0x791   :  { %4143 = vmatprep.subr.msk.mxu0 %vm44_vm0, %v675_v27  ;;  %4316 = vpow2.f32 %v801_v29 }
 0x79a   :  { %v4311_v1 = vpop.eup %4310 }
 0x79b   :  { %v806_v2 = vsel %vm782_vm5, %v4311_v1, 0.0 }
 0x79c   :  { %v4313_v25 = vpop.eup %4312  ;;  %807 = vadd.xlane.f32.xlu0 %v806_v2 }
 0x79d   :  { %4140 = vmatprep.mubr.msk.f32.mxu0 %vm782_vm5, %v4313_v25  ;;  %v803_v26 = vsel %vm782_vm5, %v4313_v25, 0.0  ;;  %v4315_v32 = vpop.eup %4314  ;;  %v1132_v25 = vld [vmem:[%s5055_s4 + $0xb0] sm:$0x7] }
 0x79e   :  { %804 = vadd.xlane.f32.xlu1 %v803_v26  ;;  %4141 = vmatmul.mubr.msk.f32.vlgmr.msra.gmra.mxu0 %vm782_vm5, %v4311_v1  ;;  %v4317_v33 = vpop.eup %4316  ;;  %v815_v40 = vmul.f32 %v4315_v32, %v3855_v36  ;;  %v3865_v26 = vld [vmem:[%s5055_s4 + $0xa8] ss:$0 sm:$0xff] }
 0x79f   :  { %4144 = vmatpush3.msk.msra.mxu0 %vm44_vm0, %v675_v27  ;;  %v816_v37 = vmul.f32 %v4317_v33, %v3855_v36 }
 0x7a0   :  { %4153 = vmatprep.subr.msk.mxu0 %vm1145_vm7, %v1132_v25 }
 0x825   :  { %v808_v31 = vpop.xlane.xlu0 %807 }
 0x826   :  { %v810_v35 = vadd.f32 %v4317_v33, %v808_v31  ;;  %v3869_v33 = vld [vmem:[%s5055_s4 + $0xb8] ss:$0 sm:$0xff] }
 0x827   :  { %v805_v30 = vpop.xlane.xlu1 %804 }
 0x828   :  { %v809_v34 = vadd.f32 %v4315_v32, %v805_v30 }
 0x82a   :  { %4318 = vrcp.f32 %v809_v34 }
 0x82b   :  { %4320 = vrcp.f32 %v810_v35 }
 0x837   :  { %v4319_v45 = vpop.eup %4318 }
 0x838   :  { %v4321_v46 = vpop.eup %4320 }
 0x85e   :  { %v4142_v38 = vpop.f32.mrf.mxu0 }
 0x85f   :  { %v903_v42 = vadd.f32 %v4142_v38, %v816_v37 }
 0x860   :  { %v897_v43 = vpop.f32.mrf.mxu0 }
 0x861   :  { %v898_v44 = vadd.f32 %v897_v43, %v815_v40  ;;  %v909_v48 = vmul.f32 %v4321_v46, %v903_v42 }
 0x863   :  { %v908_v47 = vmul.f32 %v4319_v45, %v898_v44 }
 0x865   :  { %4145 = vmatprep.mubr.msk.f32.mxu0 %vm37_vm1, %v908_v47 }
 0x866   :  { %4146 = vmatmul.mubr.msk.f32.vlgmr.msra.gmra.mxu0 %vm37_vm1, %v909_v48 }
 0x867   :  { %4154 = vmatpush3.msk.msra.mxu0 %vm1145_vm7, %v1132_v25 }
 0x926   :  { %v4147_v50 = vpop.f32.mrf.mxu0 }
 0x927   :  { %v995_v51 = vadd.f32 %v4147_v50, %v3859_v49 }
 0x928   :  { %v989_v52 = vpop.f32.mrf.mxu0 }
 0x929   :  { %v990_v53 = vadd.f32 %v3859_v49, %v989_v52  ;;  %v999_v54 = vadd.f32 %v995_v51, %v4578_v41 }
 0x92b   :  { %v1005_v55 = vsel %vm37_vm1, %v999_v54, 0.0  ;;  %v998_v56 = vadd.f32 %v990_v53, %v4574_v39  ;;  %v1040_v39 = vld [vmem:[%s5055_s4 + $0xa0] sm:$0x7f] }
 0x92c   :  { %1006 = vadd.xlane.f32.xlu1 %v1005_v55  ;;  %4148 = vmatprep.subr.msk.mxu1 %vm44_vm0, %v1040_v39 }
 0x92d   :  { %v1002_v57 = vsel %vm37_vm1, %v998_v56, 0.0  ;;  %4149 = vmatpush3.msk.msra.mxu1 %vm44_vm0, %v1040_v39 }
 0x92e   :  { %1003 = vadd.xlane.f32.xlu0 %v1002_v57 }
 0x9b5   :  { %v1007_v59 = vpop.xlane.xlu1 %1006 }
 0x9b6   :  { %v1009_v60 = vmul.f32 0.14285715, %v1007_v59 }
 0x9b7   :  { %v1004_v62 = vpop.xlane.xlu0 %1003 }
 0x9b8   :  { %v1011_v63 = vsub.f32 %v999_v54, %v1009_v60  ;;  %v1008_v0 = vmul.f32 0.14285715, %v1004_v62 }
 0x9ba   :  { %v1010_v3 = vsub.f32 %v998_v56, %v1008_v0  ;;  %v1013_v4 = vmul.f32 %v1011_v63, %v1011_v63  ;;  %v1268_v56 = vld [vmem:[%s5055_s4 + $0xc0] sm:$0x7f] }
 0x9bb   :  { %4158 = vmatprep.subr.msk.mxu1 %vm44_vm0, %v1268_v56 }
 0x9bc   :  { %v1017_v5 = vsel %vm37_vm1, %v1013_v4, 0.0  ;;  %v1012_v6 = vmul.f32 %v1010_v3, %v1010_v3  ;;  %v3873_v4 = vld [vmem:[%s5055_s4 + $0x90] ss:$0 sm:$0xff] }
 0x9bd   :  { %1018 = vadd.xlane.f32.xlu1 %v1017_v5 }
 0x9be   :  { %v1014_v41 = vsel %vm37_vm1, %v1012_v6, 0.0 }
 0x9bf   :  { %1015 = vadd.xlane.f32.xlu0 %v1014_v41 }
 0xa46   :  { %v1019_v7 = vpop.xlane.xlu1 %1018 }
 0xa47   :  { %v1021_v8 = vmul.f32 0.14285715, %v1019_v7  ;;  %v3874_v7 = vld [vmem:[%s5055_s4 + $0x98] ss:$0 sm:$0xff] }
 0xa48   :  { %v1016_v9 = vpop.xlane.xlu0 %1015 }
 0xa49   :  { %v1023_v10 = vadd.f32 1e-05, %v1021_v8  ;;  %v1020_v11 = vmul.f32 0.14285715, %v1016_v9 }
 0xa4b   :  { %4322 = vrsqrt.f32 %v1023_v10  ;;  %v1022_v12 = vadd.f32 1e-05, %v1020_v11  ;;  %v3875_v11 = vld [vmem:[%s5055_s4 + $0xc8] ss:$0 sm:$0xff] }
 0xa4d   :  { %4324 = vrsqrt.f32 %v1022_v12 }
 0xa58   :  { %v4323_v13 = vpop.eup %4322 }
 0xa59   :  { %v1027_v15 = vmul.f32 %v4323_v13, %v1011_v63 }
 0xa5a   :  { %v4325_v17 = vpop.eup %4324 }
 0xa5b   :  { %v1026_v18 = vmul.f32 %v4325_v17, %v1010_v3  ;;  %v1033_v20 = vmul.f32 %v3863_v14, %v1027_v15  ;;  %v3883_v17 = vld [vmem:[%s5055_s4 + $0xd0] ss:$0 sm:$0xff] }
 0xa5d   :  { %v1032_v22 = vmul.f32 %v3863_v14, %v1026_v18  ;;  %v1039_v2 = vadd.f32 %v3864_v21, %v1033_v20 }
 0xa5f   :  { %v1038_v1 = vadd.f32 %v3864_v21, %v1032_v22 }
 0xa61   :  { %4150 = vmatprep.mubr.msk.f32.mxu1 %vm37_vm1, %v1038_v1 }
 0xa62   :  { %4151 = vmatmul.mubr.msk.f32.vlgmr.msra.gmra.mxu1 %vm37_vm1, %v1039_v2 }
 0xa63   :  { %4159 = vmatpush3.msk.msra.mxu1 %vm44_vm0, %v1268_v56 }
 0xb22   :  { %v4152_v27 = vpop.f32.mrf.mxu1 }
 0xb23   :  { %v1127_v28 = vadd.f32 %v4152_v27, %v3865_v26 }
 0xb24   :  { %v1121_v29 = vpop.f32.mrf.mxu1 }
 0xb25   :  { %v1122_v30 = vadd.f32 %v3865_v26, %v1121_v29  ;;  %v1131_v32 = vmax.f32 %v1127_v28, 0.0 }
 0xb27   :  { %v1130_v31 = vmax.f32 %v1122_v30, 0.0 }
 0xb29   :  { %4155 = vmatprep.mubr.msk.f32.mxu0 %vm1138_vm8, %v1130_v31 }
 0xb2a   :  { %4156 = vmatmul.mubr.msk.f32.vlgmr.msra.gmra.mxu0 %vm1138_vm8, %v1131_v32 }
 0xbea   :  { %v4157_v34 = vpop.f32.mrf.mxu0 }
 0xbeb   :  { %v1221_v35 = vadd.f32 %v4157_v34, %v3869_v33 }
 0xbec   :  { %v1215_v36 = vpop.f32.mrf.mxu0 }
 0xbed   :  { %v1225_v37 = vmax.f32 %v1221_v35, 0.0  ;;  %v1216_v38 = vadd.f32 %v3869_v33, %v1215_v36 }
 0xbef   :  { %v1224_v40 = vmax.f32 %v1216_v38, 0.0  ;;  %v1227_v42 = vadd.f32 %v1225_v37, %v1039_v2 }
 0xbf1   :  { %v1233_v43 = vsel %vm37_vm1, %v1227_v42, 0.0  ;;  %v1226_v44 = vadd.f32 %v1224_v40, %v1038_v1 }
 0xbf2   :  { %1234 = vadd.xlane.f32.xlu1 %v1233_v43 }
 0xbf3   :  { %v1230_v45 = vsel %vm37_vm1, %v1226_v44, 0.0 }
 0xbf4   :  { %1231 = vadd.xlane.f32.xlu0 %v1230_v45 }
 0xc7b   :  { %v1235_v46 = vpop.xlane.xlu1 %1234 }
 0xc7c   :  { %v1237_v47 = vmul.f32 0.14285715, %v1235_v46 }
 0xc7d   :  { %v1232_v48 = vpop.xlane.xlu0 %1231 }
 0xc7e   :  { %v1239_v49 = vsub.f32 %v1227_v42, %v1237_v47  ;;  %v1236_v50 = vmul.f32 0.14285715, %v1232_v48 }
 0xc80   :  { %v1238_v51 = vsub.f32 %v1226_v44, %v1236_v50  ;;  %v1241_v52 = vmul.f32 %v1239_v49, %v1239_v49 }
 0xc82   :  { %v1245_v53 = vsel %vm37_vm1, %v1241_v52, 0.0  ;;  %v1240_v54 = vmul.f32 %v1238_v51, %v1238_v51 }
 0xc83   :  { %1246 = vadd.xlane.f32.xlu1 %v1245_v53  ;;  %v1360_v53 = vld [vmem:[%s5055_s4 + $0xe0] sm:$0x7f] }
 0xc84   :  { %v1242_v55 = vsel %vm37_vm1, %v1240_v54, 0.0 }
 0xc85   :  { %1243 = vadd.xlane.f32.xlu0 %v1242_v55 }
 0xd0c   :  { %v1247_v57 = vpop.xlane.xlu1 %1246 }
 0xd0d   :  { %v1249_v59 = vmul.f32 0.14285715, %v1247_v57 }
 0xd0e   :  { %v1244_v60 = vpop.xlane.xlu0 %1243 }
 0xd0f   :  { %v1251_v62 = vadd.f32 1e-05, %v1249_v59  ;;  %v1248_v63 = vmul.f32 0.14285715, %v1244_v60 }
 0xd11   :  { %4326 = vrsqrt.f32 %v1251_v62  ;;  %v1250_v0 = vadd.f32 1e-05, %v1248_v63 }
 0xd13   :  { %4328 = vrsqrt.f32 %v1250_v0  ;;  %v3884_v0 = vld [vmem:[%s5055_s4 + $0xd8] ss:$0 sm:$0xff] }
 0xd1e   :  { %v4327_v3 = vpop.eup %4326 }
 0xd1f   :  { %v1255_v5 = vmul.f32 %v4327_v3, %v1239_v49 }
 0xd20   :  { %v4329_v6 = vpop.eup %4328 }
 0xd21   :  { %v1254_v41 = vmul.f32 %v4329_v6, %v1238_v51  ;;  %v1261_v39 = vmul.f32 %v3873_v4, %v1255_v5 }
 0xd23   :  { %v1260_v8 = vmul.f32 %v3873_v4, %v1254_v41  ;;  %v4683_v10 = vadd.f32 %v3874_v7, %v1261_v39 }
 0xd25   :  { %v4681_v9 = vadd.f32 %v3874_v7, %v1260_v8 }
 0xd27   :  { %4160 = vmatprep.mubr.msk.f32.mxu1 %vm37_vm1, %v4681_v9 }
 0xd28   :  { %4161 = vmatmul.mubr.msk.f32.vlgmr.msra.gmra.mxu1 %vm37_vm1, %v4683_v10 }
 0xde8   :  { %v4162_v12 = vpop.f32.mrf.mxu1 }
 0xde9   :  { %v1355_v13 = vadd.f32 %v4162_v12, %v3875_v11 }
 0xdea   :  { %v1349_v14 = vpop.f32.mrf.mxu1 }
 0xdeb   :  { %v1350_v15 = vadd.f32 %v3875_v11, %v1349_v14  ;;  %1366 = vrot.lane.b32.xlu0 %v1355_v13, %s4430_s0  ;;  %v1460_v18 = vmul.f32 %v3883_v17, %v1355_v13 }
 0xded   :  { %1364 = vrot.lane.b32.xlu1 %v1350_v15, %s4430_s0  ;;  %4167 = vmatprep.mubr.msk.f32.mxu0 %vm37_vm1, %v1350_v15  ;;  %v1464_v20 = vsel %vm37_vm1, %v1460_v18, 0.0  ;;  %v1459_v21 = vmul.f32 %v3883_v17, %v1350_v15 }
 0xdef   :  { %v1461_v22 = vsel %vm37_vm1, %v1459_v21, 0.0 }
 0xe0a   :  { %1465 = vadd.xlane.f32.xlu0 %v1464_v20 }
 0xe11   :  { %1462 = vadd.xlane.f32.xlu1 %v1461_v22 }
 0xe5d   :  { %v1367_v1 = vpop.permute.xlu0 %1366 }
 0xe5e   :  { %4163 = vmatprep.subr.msk.mxu0 %vm37_vm1, %v1367_v1 }
 0xe5f   :  { %4164 = vmatpush3.xpose.msk.msra.mxu0 %vm37_vm1, %v1367_v1  ;;  %v1365_v2 = vpop.permute.xlu1 %1364 }
 0xe60   :  { %4165 = vmatprep.subr.msk.mxu0 %vm37_vm1, %v1365_v2 }
 0xe63   :  { %4166 = vmatpush3.xpose.msk.msra.mxu0 %vm37_vm1, %v1365_v2 }
 0xe66   :  { %4168 = vmatmul.mubr.msk.f32.vlgmr.msra.gmra.mxu0 %vm37_vm1, %v1355_v13 }
 0xe93   :  { %v1466_v33 = vpop.xlane.xlu0 %1465 }
 0xe94   :  { %v1468_v35 = vmul.f32 0.37796447, %v1466_v33 }
 0xe9a   :  { %v1463_v34 = vpop.xlane.xlu1 %1462 }
 0xe9b   :  { %v1467_v37 = vmul.f32 0.37796447, %v1463_v34 }
 0xf26   :  { %v4169_v25 = vpop.f32.mrf.mxu0 }
 0xf27   :  { %v1452_v26 = vmul.f32 0.37796447, %v4169_v25 }
 0xf28   :  { %v1442_v27 = vpop.f32.mrf.mxu0 }
 0xf29   :  { %v1451_v28 = vmul.f32 0.37796447, %v1442_v27  ;;  %v1454_v29 = vadd.f32 %v1452_v26, %v4508_v16 }
 0xf2b   :  { %v1472_v30 = vsel %vm234_vm2, %v1454_v29, -inf  ;;  %v1453_v31 = vadd.f32 %v1451_v28, %v4513_v19 }
 0xf2c   :  { %1473 = vmax.xlane.f32.xlu1 %v1472_v30 }
 0xf2d   :  { %v1469_v32 = vsel %vm234_vm2, %v1453_v31, -inf }
 0xf2e   :  { %1470 = vmax.xlane.f32.xlu0 %v1469_v32  ;;  %v1724_v32 = vld [vmem:[%s5055_s4 + $0xf0] sm:$0x7f] }
 0xf2f   :  { %4182 = vmatprep.subr.msk.mxu0 %vm44_vm0, %v1724_v32 }
 0xf30   :  { %4183 = vmatpush3.msk.msra.mxu0 %vm44_vm0, %v1724_v32 }
 0xf3d   :  { %1503 = vrot.lane.b32.xlu1 %v1350_v15, %s4431_s11 }
 0xf44   :  { %1505 = vrot.lane.b32.xlu0 %v1355_v13, %s4431_s11  ;;  %v3887_v13 = vld [vmem:[%s5055_s4 + $0xe8] ss:$0 sm:$0xff] }
 0xfb5   :  { %v1474_v36 = vpop.xlane.xlu1 %1473 }
 0xfb6   :  { %v1476_v38 = vmax.f32 %v1474_v36, %v1468_v35 }
 0xfb7   :  { %v1471_v40 = vpop.xlane.xlu0 %1470 }
 0xfb8   :  { %v1478_v16 = vsub.f32 %v1454_v29, %v1476_v38  ;;  %v1484_v42 = vsub.f32 %v1468_v35, %v1476_v38  ;;  %v1475_v43 = vmax.f32 %v1471_v40, %v1467_v37 }
 0xfb9   :  { %v1504_v48 = vpop.permute.xlu1 %1503 }
 0xfba   :  { %v1481_v44 = vmul.f32 1.442695, %v1478_v16  ;;  %v1477_v19 = vsub.f32 %v1453_v31, %v1475_v43  ;;  %v1483_v45 = vsub.f32 %v1467_v37, %v1475_v43  ;;  %v1487_v55 = vmul.f32 1.442695, %v1484_v42  ;;  %v3891_v16 = vld [vmem:[%s5055_s4 + $0x130] ss:$0 sm:$0xff] }
 0xfbb   :  { %v1506_v46 = vpop.permute.xlu0 %1505 }
 0xfbc   :  { %4330 = vpow2.f32 %v1481_v44  ;;  %v1479_v47 = vmul.f32 1.442695, %v1477_v19  ;;  %4170 = vmatprep.subr.mxu1 %v1506_v46  ;;  %v1485_v54 = vmul.f32 1.442695, %v1483_v45 }
 0xfbd   :  { %4171 = vmatpush3.msra.mxu1 %v1506_v46 }
 0xfbe   :  { %4332 = vpow2.f32 %v1479_v47  ;;  %4172 = vmatprep.subr.mxu1 %v1504_v48 }
 0xfbf   :  { %4173 = vmatpush3.msra.mxu1 %v1504_v48  ;;  %4334 = vpow2.f32 %v1485_v54  ;;  %v3897_v48 = vld [vmem:[%s5055_s4 + $0x108] ss:$0 sm:$0xff] }
 0xfc0   :  { %4177 = vmatprep.subr.msk.mxu1 %vm44_vm0, %v1360_v53  ;;  %4336 = vpow2.f32 %v1487_v55  ;;  %v3905_v55 = vld [vmem:[%s5055_s4 + $0x110] ss:$0 sm:$0xff] }
 0xfc9   :  { %v4331_v49 = vpop.eup %4330 }
 0xfca   :  { %v1492_v50 = vsel %vm234_vm2, %v4331_v49, 0.0 }
 0xfcb   :  { %v4333_v51 = vpop.eup %4332  ;;  %1493 = vadd.xlane.f32.xlu0 %v1492_v50 }
 0xfcc   :  { %4174 = vmatprep.mubr.msk.f32.mxu1 %vm234_vm2, %v4333_v51  ;;  %v1489_v52 = vsel %vm234_vm2, %v4333_v51, 0.0  ;;  %v4335_v59 = vpop.eup %4334 }
 0xfcd   :  { %1490 = vadd.xlane.f32.xlu1 %v1489_v52  ;;  %4175 = vmatmul.mubr.msk.f32.vlgmr.msra.gmra.mxu1 %vm234_vm2, %v4331_v49  ;;  %v4337_v60 = vpop.eup %4336  ;;  %v1501_v5 = vmul.f32 %v4335_v59, %v3884_v0 }
 0xfce   :  { %4178 = vmatpush3.msk.msra.mxu1 %vm44_vm0, %v1360_v53  ;;  %v1502_v3 = vmul.f32 %v4337_v60, %v3884_v0  ;;  %v3893_v53 = vld [vmem:[%s5055_s4 + $0xf8] ss:$0 sm:$0xff] }
0x1054   :  { %v1494_v57 = vpop.xlane.xlu0 %1493 }
0x1055   :  { %v1496_v63 = vadd.f32 %v4337_v60, %v1494_v57 }
0x1056   :  { %v1491_v56 = vpop.xlane.xlu1 %1490 }
0x1057   :  { %v1495_v62 = vadd.f32 %v4335_v59, %v1491_v56 }
0x1059   :  { %4338 = vrcp.f32 %v1495_v62 }
0x105a   :  { %4340 = vrcp.f32 %v1496_v63 }
0x1066   :  { %v4339_v7 = vpop.eup %4338 }
0x1067   :  { %v4341_v8 = vpop.eup %4340 }
0x108d   :  { %v4176_v4 = vpop.f32.mrf.mxu1 }
0x108e   :  { %v1587_v6 = vadd.f32 %v4176_v4, %v1502_v3 }
0x108f   :  { %v1581_v41 = vpop.f32.mrf.mxu1 }
0x1090   :  { %v1582_v39 = vadd.f32 %v1581_v41, %v1501_v5  ;;  %v1593_v12 = vmul.f32 %v4341_v8, %v1587_v6 }
0x1092   :  { %v1592_v11 = vmul.f32 %v4339_v7, %v1582_v39 }
0x1094   :  { %4179 = vmatprep.mubr.msk.f32.mxu1 %vm37_vm1, %v1592_v11 }
0x1095   :  { %4180 = vmatmul.mubr.msk.f32.vlgmr.msra.gmra.mxu1 %vm37_vm1, %v1593_v12 }
0x1096   :  { %4189 = vmatprep.mubr.msk.f32.mxu1 %vm587_vm4, %v4550_v23 }
0x1155   :  { %v4181_v14 = vpop.f32.mrf.mxu1 }
0x1156   :  { %v1679_v15 = vadd.f32 %v4181_v14, %v3887_v13 }
0x1157   :  { %v1673_v17 = vpop.f32.mrf.mxu1 }
0x1158   :  { %v1674_v18 = vadd.f32 %v3887_v13, %v1673_v17  ;;  %v1683_v20 = vadd.f32 %v1679_v15, %v4683_v10 }
0x115a   :  { %v1689_v21 = vsel %vm37_vm1, %v1683_v20, 0.0  ;;  %v1682_v22 = vadd.f32 %v1674_v18, %v4681_v9  ;;  %v1814_v9 = vld [vmem:[%s5055_s4 + $0x100] sm:$0x3f] }
0x115b   :  { %1690 = vadd.xlane.f32.xlu1 %v1689_v21  ;;  %4187 = vmatprep.subr.msk.mxu1 %vm594_vm3, %v1814_v9 }
0x115c   :  { %v1686_v1 = vsel %vm37_vm1, %v1682_v22, 0.0  ;;  %4188 = vmatpush3.msk.msra.mxu1 %vm594_vm3, %v1814_v9 }
0x115d   :  { %1687 = vadd.xlane.f32.xlu0 %v1686_v1  ;;  %4190 = vmatmul.mubr.msk.f32.vlgmr.msra.gmra.mxu1 %vm587_vm4, %v4558_v24  ;;  %v3892_v24 = vld [vmem:[%s5055_s4 + $0x138] ss:$0 sm:$0xff] }
0x11e4   :  { %v1691_v2 = vpop.xlane.xlu1 %1690 }
0x11e5   :  { %v1693_v23 = vmul.f32 0.14285715, %v1691_v2 }
0x11e6   :  { %v1688_v25 = vpop.xlane.xlu0 %1687 }
0x11e7   :  { %v1695_v26 = vsub.f32 %v1683_v20, %v1693_v23  ;;  %v1692_v27 = vmul.f32 0.14285715, %v1688_v25 }
0x11e9   :  { %v1694_v28 = vsub.f32 %v1682_v22, %v1692_v27  ;;  %v1697_v29 = vmul.f32 %v1695_v26, %v1695_v26 }
0x11eb   :  { %v1701_v30 = vsel %vm37_vm1, %v1697_v29, 0.0  ;;  %v1696_v31 = vmul.f32 %v1694_v28, %v1694_v28 }
0x11ec   :  { %1702 = vadd.xlane.f32.xlu1 %v1701_v30  ;;  %v1900_v30 = vld [vmem:[%s5055_s4 + $0x120] sm:$0x7f] }
0x11ed   :  { %v1698_v10 = vsel %vm37_vm1, %v1696_v31, 0.0 }
0x11ee   :  { %1699 = vadd.xlane.f32.xlu0 %v1698_v10 }
0x121d   :  { %v4191_v49 = vpop.f32.mrf.mxu1 }
0x121e   :  { %v1895_v50 = vadd.f32 %v4191_v49, %v3897_v48  ;;  %v3910_v49 = vld [vmem:[%s5055_s4 + $0x128] ss:$0 sm:$0xff] }
0x121f   :  { %v1889_v51 = vpop.f32.mrf.mxu1 }
0x1220   :  { %4192 = vmatprep.subr.msk.mxu0 %vm37_vm1, %v1895_v50  ;;  %v1890_v52 = vadd.f32 %v3897_v48, %v1889_v51 }
0x1275   :  { %v1703_v33 = vpop.xlane.xlu1 %1702 }
0x1276   :  { %v1705_v34 = vmul.f32 0.14285715, %v1703_v33 }
0x1277   :  { %v1700_v35 = vpop.xlane.xlu0 %1699 }
0x1278   :  { %v1707_v36 = vadd.f32 1e-05, %v1705_v34  ;;  %v1704_v37 = vmul.f32 0.14285715, %v1700_v35 }
0x127a   :  { %4342 = vrsqrt.f32 %v1707_v36  ;;  %v1706_v38 = vadd.f32 1e-05, %v1704_v37  ;;  %v3906_v37 = vld [vmem:[%s5055_s4 + $0x118] ss:$0 sm:$0xff] }
0x127c   :  { %4344 = vrsqrt.f32 %v1706_v38 }
0x1287   :  { %v4343_v40 = vpop.eup %4342 }
0x1288   :  { %v1711_v42 = vmul.f32 %v4343_v40, %v1695_v26 }
0x1289   :  { %v4345_v43 = vpop.eup %4344 }
0x128a   :  { %v1710_v44 = vmul.f32 %v4345_v43, %v1694_v28  ;;  %v1717_v19 = vmul.f32 %v3891_v16, %v1711_v42 }
0x128c   :  { %v1716_v45 = vmul.f32 %v3891_v16, %v1710_v44  ;;  %v4756_v47 = vadd.f32 %v3892_v24, %v1717_v19 }
0x128e   :  { %v4754_v46 = vadd.f32 %v3892_v24, %v1716_v45 }
0x1290   :  { %4184 = vmatprep.mubr.msk.f32.mxu0 %vm37_vm1, %v4754_v46 }
0x1291   :  { %4185 = vmatmul.mubr.msk.f32.vlgmr.msra.gmra.mxu0 %vm37_vm1, %v4756_v47 }
0x1292   :  { %4193 = vmatpush3.xpose.msk.msra.mxu0 %vm37_vm1, %v1895_v50 }
0x1293   :  { %4194 = vmatprep.subr.msk.mxu0 %vm37_vm1, %v1890_v52 }
0x1296   :  { %4195 = vmatpush3.xpose.msk.msra.mxu0 %vm37_vm1, %v1890_v52 }
0x1351   :  { %v4186_v54 = vpop.f32.mrf.mxu0 }
0x1352   :  { %v1811_v56 = vadd.f32 %v4186_v54, %v3893_v53 }
0x1353   :  { %v1805_v57 = vpop.f32.mrf.mxu0 }
0x1354   :  { %v1806_v59 = vadd.f32 %v3893_v53, %v1805_v57  ;;  %v1998_v60 = vmul.f32 %v3905_v55, %v1811_v56 }
0x1356   :  { %4196 = vmatprep.mubr.msk.f32.mxu0 %vm37_vm1, %v1806_v59  ;;  %v2002_v62 = vsel %vm37_vm1, %v1998_v60, 0.0  ;;  %v1997_v63 = vmul.f32 %v3905_v55, %v1806_v59 }
0x1357   :  { %2003 = vadd.xlane.f32.xlu1 %v2002_v62  ;;  %4197 = vmatmul.mubr.msk.f32.vlgmr.msra.gmra.mxu0 %vm37_vm1, %v1811_v56 }
0x1358   :  { %v1999_v0 = vsel %vm37_vm1, %v1997_v63, 0.0 }
0x1359   :  { %2000 = vadd.xlane.f32.xlu0 %v1999_v0 }
0x13e0   :  { %v2004_v11 = vpop.xlane.xlu1 %2003 }
0x13e1   :  { %v2006_v13 = vmul.f32 0.37796447, %v2004_v11 }
0x13e2   :  { %v2001_v12 = vpop.xlane.xlu0 %2000 }
0x13e3   :  { %v2005_v15 = vmul.f32 0.37796447, %v2001_v12 }
0x1417   :  { %v4198_v3 = vpop.f32.mrf.mxu0 }
0x1418   :  { %v1990_v4 = vmul.f32 0.37796447, %v4198_v3 }
0x1419   :  { %v1980_v5 = vpop.f32.mrf.mxu0 }
0x141a   :  { %v1989_v6 = vmul.f32 0.37796447, %v1980_v5  ;;  %v1992_v41 = vadd.f32 %v1990_v4, %v4602_v58 }
0x141c   :  { %v2010_v39 = vsel %vm782_vm5, %v1992_v41, -inf  ;;  %v1991_v7 = vadd.f32 %v1989_v6, %v4607_v61 }
0x141d   :  { %2011 = vmax.xlane.f32.xlu1 %v2010_v39 }
0x141e   :  { %v2007_v8 = vsel %vm782_vm5, %v1991_v7, -inf }
0x141f   :  { %2008 = vmax.xlane.f32.xlu0 %v2007_v8 }
0x142e   :  { %2041 = vrot.lane.b32.xlu1 %v1890_v52, %s4430_s0 }
0x1435   :  { %2043 = vrot.lane.b32.xlu0 %v1895_v50, %s4430_s0 }
0x14a6   :  { %v2012_v14 = vpop.xlane.xlu1 %2011 }
0x14a7   :  { %v2014_v17 = vmax.f32 %v2012_v14, %v2006_v13  ;;  %v3914_v14 = vld [vmem:[%s5055_s4 + $0x140] ss:$0 sm:$0xff] }
0x14a8   :  { %v2009_v18 = vpop.xlane.xlu0 %2008 }
0x14a9   :  { %v2016_v58 = vsub.f32 %v1992_v41, %v2014_v17  ;;  %v2022_v20 = vsub.f32 %v2006_v13, %v2014_v17  ;;  %v2013_v21 = vmax.f32 %v2009_v18, %v2005_v15 }
0x14aa   :  { %v2042_v25 = vpop.permute.xlu1 %2041 }
0x14ab   :  { %v2019_v22 = vmul.f32 1.442695, %v2016_v58  ;;  %v2015_v61 = vsub.f32 %v1991_v7, %v2013_v21  ;;  %v2021_v1 = vsub.f32 %v2005_v15, %v2013_v21  ;;  %v2025_v10 = vmul.f32 1.442695, %v2022_v20  ;;  %v3915_v20 = vld [vmem:[%s5055_s4 + $0x148] ss:$0 sm:$0xff] }
0x14ac   :  { %v2044_v2 = vpop.permute.xlu0 %2043 }
0x14ad   :  { %4346 = vpow2.f32 %v2019_v22  ;;  %v2017_v23 = vmul.f32 1.442695, %v2015_v61  ;;  %4199 = vmatprep.subr.msk.mxu1 %vm828_vm6, %v2044_v2  ;;  %v2023_v31 = vmul.f32 1.442695, %v2021_v1  ;;  %v2355_v1 = vld [vmem:[%s5055_s4 + $0x170] sm:$0x7] }
0x14ae   :  { %4200 = vmatpush3.msk.msra.mxu1 %vm828_vm6, %v2044_v2  ;;  %v3916_v2 = vld [vmem:[%s5055_s4 + $0x168] ss:$0 sm:$0xff] }
0x14af   :  { %4348 = vpow2.f32 %v2017_v23  ;;  %4201 = vmatprep.subr.mxu1 %v2042_v25 }
0x14b0   :  { %4202 = vmatpush3.msra.mxu1 %v2042_v25  ;;  %4350 = vpow2.f32 %v2023_v31 }
0x14b1   :  { %4206 = vmatprep.subr.msk.mxu1 %vm44_vm0, %v1900_v30  ;;  %4352 = vpow2.f32 %v2025_v10 }
0x14ba   :  { %v4347_v26 = vpop.eup %4346 }
0x14bb   :  { %v2030_v27 = vsel %vm782_vm5, %v4347_v26, 0.0 }
0x14bc   :  { %v4349_v28 = vpop.eup %4348  ;;  %2031 = vadd.xlane.f32.xlu0 %v2030_v27 }
0x14bd   :  { %4203 = vmatprep.mubr.msk.f32.mxu1 %vm782_vm5, %v4349_v28  ;;  %v2027_v29 = vsel %vm782_vm5, %v4349_v28, 0.0  ;;  %v4351_v33 = vpop.eup %4350 }
0x14be   :  { %2028 = vadd.xlane.f32.xlu1 %v2027_v29  ;;  %4204 = vmatmul.mubr.msk.f32.vlgmr.msra.gmra.mxu1 %vm782_vm5, %v4347_v26  ;;  %v4353_v34 = vpop.eup %4352  ;;  %v2039_v16 = vmul.f32 %v4351_v33, %v3906_v37 }
0x14bf   :  { %4207 = vmatpush3.msk.msra.mxu1 %vm44_vm0, %v1900_v30  ;;  %v2040_v38 = vmul.f32 %v4353_v34, %v3906_v37  ;;  %v3920_v30 = vld [vmem:[%s5055_s4 + $0x178] ss:$0 sm:$0xff] }
0x14c0   :  { %4216 = vmatprep.subr.msk.mxu1 %vm1145_vm7, %v2355_v1 }
0x1545   :  { %v2032_v32 = vpop.xlane.xlu0 %2031 }
0x1546   :  { %v2034_v36 = vadd.f32 %v4353_v34, %v2032_v32 }
0x1547   :  { %v2029_v9 = vpop.xlane.xlu1 %2028 }
0x1548   :  { %v2033_v35 = vadd.f32 %v4351_v33, %v2029_v9 }
0x154a   :  { %4354 = vrcp.f32 %v2033_v35 }
0x154b   :  { %4356 = vrcp.f32 %v2034_v36 }
0x1557   :  { %v4355_v19 = vpop.eup %4354 }
0x1558   :  { %v4357_v24 = vpop.eup %4356 }
0x157e   :  { %v4205_v40 = vpop.f32.mrf.mxu1 }
0x157f   :  { %v2126_v42 = vadd.f32 %v4205_v40, %v2040_v38 }
0x1580   :  { %v2120_v43 = vpop.f32.mrf.mxu1 }
0x1581   :  { %v2121_v44 = vadd.f32 %v2120_v43, %v2039_v16  ;;  %v2132_v48 = vmul.f32 %v4357_v24, %v2126_v42 }
0x1583   :  { %v2131_v45 = vmul.f32 %v4355_v19, %v2121_v44 }
0x1585   :  { %4208 = vmatprep.mubr.msk.f32.mxu1 %vm37_vm1, %v2131_v45 }
0x1586   :  { %4209 = vmatmul.mubr.msk.f32.vlgmr.msra.gmra.mxu1 %vm37_vm1, %v2132_v48 }
0x1587   :  { %4217 = vmatpush3.msk.msra.mxu1 %vm1145_vm7, %v2355_v1 }
0x1646   :  { %v4210_v50 = vpop.f32.mrf.mxu1 }
0x1647   :  { %v2218_v51 = vadd.f32 %v4210_v50, %v3910_v49  ;;  %v2489_v50 = vld [vmem:[%s5055_s4 + $0x180] sm:$0x7f] }
0x1648   :  { %v2212_v52 = vpop.f32.mrf.mxu1 }
0x1649   :  { %v2213_v53 = vadd.f32 %v3910_v49, %v2212_v52  ;;  %v2222_v54 = vadd.f32 %v2218_v51, %v4756_v47 }
0x164b   :  { %v2228_v55 = vsel %vm37_vm1, %v2222_v54, 0.0  ;;  %v2221_v56 = vadd.f32 %v2213_v53, %v4754_v46  ;;  %v2263_v46 = vld [vmem:[%s5055_s4 + $0x160] sm:$0x7f] }
0x164c   :  { %2229 = vadd.xlane.f32.xlu1 %v2228_v55  ;;  %4211 = vmatprep.subr.msk.mxu0 %vm44_vm0, %v2263_v46 }
0x164d   :  { %v2225_v57 = vsel %vm37_vm1, %v2221_v56, 0.0  ;;  %4212 = vmatpush3.msk.msra.mxu0 %vm44_vm0, %v2263_v46 }
0x164e   :  { %2226 = vadd.xlane.f32.xlu0 %v2225_v57  ;;  %4221 = vmatprep.subr.msk.mxu0 %vm44_vm0, %v2489_v50 }
0x16d5   :  { %v2230_v59 = vpop.xlane.xlu1 %2229 }
0x16d6   :  { %v2232_v60 = vmul.f32 0.14285715, %v2230_v59  ;;  %v3924_v59 = vld [vmem:[%s5055_s4 + $0x150] ss:$0 sm:$0xff] }
0x16d7   :  { %v2227_v62 = vpop.xlane.xlu0 %2226 }
0x16d8   :  { %v2234_v63 = vsub.f32 %v2222_v54, %v2232_v60  ;;  %v2231_v0 = vmul.f32 0.14285715, %v2227_v62 }
0x16da   :  { %v2233_v3 = vsub.f32 %v2221_v56, %v2231_v0  ;;  %v2236_v4 = vmul.f32 %v2234_v63, %v2234_v63 }
0x16dc   :  { %v2240_v5 = vsel %vm37_vm1, %v2236_v4, 0.0  ;;  %v2235_v6 = vmul.f32 %v2233_v3, %v2233_v3 }
0x16dd   :  { %2241 = vadd.xlane.f32.xlu1 %v2240_v5 }
0x16de   :  { %v2237_v47 = vsel %vm37_vm1, %v2235_v6, 0.0 }
0x16df   :  { %2238 = vadd.xlane.f32.xlu0 %v2237_v47  ;;  %v3926_v47 = vld [vmem:[%s5055_s4 + $0x188] ss:$0 sm:$0xff] }
0x1766   :  { %v2242_v41 = vpop.xlane.xlu1 %2241 }
0x1767   :  { %v2244_v39 = vmul.f32 0.14285715, %v2242_v41 }
0x1768   :  { %v2239_v7 = vpop.xlane.xlu0 %2238 }
0x1769   :  { %v2246_v8 = vadd.f32 1e-05, %v2244_v39  ;;  %v2243_v11 = vmul.f32 0.14285715, %v2239_v7 }
0x176b   :  { %4358 = vrsqrt.f32 %v2246_v8  ;;  %v2245_v12 = vadd.f32 1e-05, %v2243_v11  ;;  %v3934_v8 = vld [vmem:[%s5055_s4 + $0x190] ss:$0 sm:$0xff] }
0x176d   :  { %4360 = vrsqrt.f32 %v2245_v12 }
0x1778   :  { %v4359_v13 = vpop.eup %4358 }
0x1779   :  { %v2250_v15 = vmul.f32 %v4359_v13, %v2234_v63 }
0x177a   :  { %v4361_v17 = vpop.eup %4360 }
0x177b   :  { %v2249_v18 = vmul.f32 %v4361_v17, %v2233_v3  ;;  %v2256_v58 = vmul.f32 %v3914_v14, %v2250_v15  ;;  %v3925_v3 = vld [vmem:[%s5055_s4 + $0x158] ss:$0 sm:$0xff] }
0x177d   :  { %v2255_v21 = vmul.f32 %v3914_v14, %v2249_v18  ;;  %v2262_v61 = vadd.f32 %v3915_v20, %v2256_v58 }
0x177f   :  { %v2261_v22 = vadd.f32 %v3915_v20, %v2255_v21 }
0x1781   :  { %4213 = vmatprep.mubr.msk.f32.mxu0 %vm37_vm1, %v2261_v22 }
0x1782   :  { %4214 = vmatmul.mubr.msk.f32.vlgmr.msra.gmra.mxu0 %vm37_vm1, %v2262_v61 }
0x1783   :  { %4222 = vmatpush3.msk.msra.mxu0 %vm44_vm0, %v2489_v50 }
0x1842   :  { %v4215_v23 = vpop.f32.mrf.mxu0 }
0x1843   :  { %v2350_v25 = vadd.f32 %v4215_v23, %v3916_v2 }
0x1844   :  { %v2344_v26 = vpop.f32.mrf.mxu0 }
0x1845   :  { %v2345_v27 = vadd.f32 %v3916_v2, %v2344_v26  ;;  %v2354_v29 = vmax.f32 %v2350_v25, 0.0  ;;  %v4403_v2 = vld [vmem:[%s5053_s2] sm:$0xff] }
0x1847   :  { %v2353_v28 = vmax.f32 %v2345_v27, 0.0 }
0x1849   :  { %4218 = vmatprep.mubr.msk.f32.mxu1 %vm1138_vm8, %v2353_v28 }
0x184a   :  { %4219 = vmatmul.mubr.msk.f32.vlgmr.msra.gmra.mxu1 %vm1138_vm8, %v2354_v29 }
0x190a   :  { %v4220_v31 = vpop.f32.mrf.mxu1 }
0x190b   :  { %v2442_v10 = vadd.f32 %v4220_v31, %v3920_v30 }
0x190c   :  { %v2436_v9 = vpop.f32.mrf.mxu1 }
0x190d   :  { %v2446_v32 = vmax.f32 %v2442_v10, 0.0  ;;  %v2437_v33 = vadd.f32 %v3920_v30, %v2436_v9 }
0x190f   :  { %v2445_v34 = vmax.f32 %v2437_v33, 0.0  ;;  %v2448_v35 = vadd.f32 %v2446_v32, %v2262_v61 }
0x1911   :  { %v2454_v36 = vsel %vm37_vm1, %v2448_v35, 0.0  ;;  %v2447_v37 = vadd.f32 %v2445_v34, %v2261_v22  ;;  %v4402_v22 = vld [vmem:[%s5053_s2 + $0x8] sm:$0xff] }
0x1912   :  { %2455 = vadd.xlane.f32.xlu1 %v2454_v36 }
0x1913   :  { %v2451_v38 = vsel %vm37_vm1, %v2447_v37, 0.0 }
0x1914   :  { %2452 = vadd.xlane.f32.xlu0 %v2451_v38 }
0x199b   :  { %v2456_v40 = vpop.xlane.xlu1 %2455 }
0x199c   :  { %v2458_v16 = vmul.f32 0.14285715, %v2456_v40 }
0x199d   :  { %v2453_v42 = vpop.xlane.xlu0 %2452 }
0x199e   :  { %v2460_v43 = vsub.f32 %v2448_v35, %v2458_v16  ;;  %v2457_v44 = vmul.f32 0.14285715, %v2453_v42 }
0x19a0   :  { %v2459_v19 = vsub.f32 %v2447_v37, %v2457_v44  ;;  %v2462_v24 = vmul.f32 %v2460_v43, %v2460_v43 }
0x19a2   :  { %v2466_v45 = vsel %vm37_vm1, %v2462_v24, 0.0  ;;  %v2461_v48 = vmul.f32 %v2459_v19, %v2459_v19 }
0x19a3   :  { %2467 = vadd.xlane.f32.xlu1 %v2466_v45 }
0x19a4   :  { %v2463_v49 = vsel %vm37_vm1, %v2461_v48, 0.0 }
0x19a5   :  { %2464 = vadd.xlane.f32.xlu0 %v2463_v49 }
0x1a2c   :  { %v2468_v51 = vpop.xlane.xlu1 %2467 }
0x1a2d   :  { %v2470_v52 = vmul.f32 0.14285715, %v2468_v51 }
0x1a2e   :  { %v2465_v53 = vpop.xlane.xlu0 %2464 }
0x1a2f   :  { %v2472_v54 = vadd.f32 1e-05, %v2470_v52  ;;  %v2469_v55 = vmul.f32 0.14285715, %v2465_v53 }
0x1a31   :  { %4362 = vrsqrt.f32 %v2472_v54  ;;  %v2471_v56 = vadd.f32 1e-05, %v2469_v55  ;;  %v3935_v54 = vld [vmem:[%s5055_s4 + $0x198] ss:$0 sm:$0xff] }
0x1a33   :  { %4364 = vrsqrt.f32 %v2471_v56 }
0x1a3e   :  { %v4363_v57 = vpop.eup %4362 }
0x1a3f   :  { %v2476_v60 = vmul.f32 %v4363_v57, %v2460_v43 }
0x1a40   :  { %v4365_v62 = vpop.eup %4364 }
0x1a41   :  { %v2475_v63 = vmul.f32 %v4365_v62, %v2459_v19  ;;  %v2482_v0 = vmul.f32 %v3924_v59, %v2476_v60  ;;  %v2581_v19 = vld [vmem:[%s5055_s4 + $0x1a0] sm:$0x7f] }
0x1a43   :  { %v2481_v4 = vmul.f32 %v3924_v59, %v2475_v63  ;;  %v4853_v6 = vadd.f32 %v3925_v3, %v2482_v0 }
0x1a45   :  { %v4851_v5 = vadd.f32 %v3925_v3, %v2481_v4 }
0x1a47   :  { %4223 = vmatprep.mubr.msk.f32.mxu0 %vm37_vm1, %v4851_v5 }
0x1a48   :  { %4224 = vmatmul.mubr.msk.f32.vlgmr.msra.gmra.mxu0 %vm37_vm1, %v4853_v6 }
0x1b08   :  { %v4225_v46 = vpop.f32.mrf.mxu0 }
0x1b09   :  { %v2576_v41 = vadd.f32 %v4225_v46, %v3926_v47  ;;  %v3938_v46 = vld [vmem:[%s5055_s4 + $0x1a8] ss:$0 sm:$0xff] }
0x1b0a   :  { %v2570_v39 = vpop.f32.mrf.mxu0 }
0x1b0b   :  { %v2571_v7 = vadd.f32 %v3926_v47, %v2570_v39  ;;  %2587 = vrot.lane.b32.xlu0 %v2576_v41, %s4430_s0  ;;  %v2681_v11 = vmul.f32 %v3934_v8, %v2576_v41  ;;  %v4404_v47 = vld [vmem:[%s5052_s1] sm:$0xff] }
0x1b0d   :  { %2585 = vrot.lane.b32.xlu1 %v2571_v7, %s4430_s0  ;;  %4230 = vmatprep.mubr.msk.f32.mxu1 %vm37_vm1, %v2571_v7  ;;  %v2685_v12 = vsel %vm37_vm1, %v2681_v11, 0.0  ;;  %v2680_v13 = vmul.f32 %v3934_v8, %v2571_v7 }
0x1b0f   :  { %v2682_v14 = vsel %vm37_vm1, %v2680_v13, 0.0 }
0x1b2a   :  { %2686 = vadd.xlane.f32.xlu0 %v2685_v12 }
0x1b31   :  { %2683 = vadd.xlane.f32.xlu1 %v2682_v14 }
0x1b7d   :  { %v2588_v15 = vpop.permute.xlu0 %2587 }
0x1b7e   :  { %4226 = vmatprep.subr.msk.mxu1 %vm37_vm1, %v2588_v15 }
0x1b7f   :  { %4227 = vmatpush3.xpose.msk.msra.mxu1 %vm37_vm1, %v2588_v15  ;;  %v2586_v17 = vpop.permute.xlu1 %2585 }
0x1b80   :  { %4228 = vmatprep.subr.msk.mxu1 %vm37_vm1, %v2586_v17 }
0x1b83   :  { %4229 = vmatpush3.xpose.msk.msra.mxu1 %vm37_vm1, %v2586_v17 }
0x1b86   :  { %4231 = vmatmul.mubr.msk.f32.vlgmr.msra.gmra.mxu1 %vm37_vm1, %v2576_v41 }
0x1bb3   :  { %v2687_v26 = vpop.xlane.xlu0 %2686 }
0x1bb4   :  { %v2689_v28 = vmul.f32 0.37796447, %v2687_v26 }
0x1bba   :  { %v2684_v27 = vpop.xlane.xlu1 %2683 }
0x1bbb   :  { %v2688_v30 = vmul.f32 0.37796447, %v2684_v27 }
0x1c46   :  { %v4232_v18 = vpop.f32.mrf.mxu1 }
0x1c47   :  { %v2673_v58 = vmul.f32 0.37796447, %v4232_v18 }
0x1c48   :  { %v2663_v20 = vpop.f32.mrf.mxu1 }
0x1c49   :  { %v2672_v21 = vmul.f32 0.37796447, %v2663_v20  ;;  %v2675_v61 = vadd.f32 %v4402_v22, %v2673_v58 }
0x1c4b   :  { %v2693_v1 = vsel %vm234_vm2, %v2675_v61, -inf  ;;  %v2674_v23 = vadd.f32 %v4403_v2, %v2672_v21  ;;  %v2945_v2 = vld [vmem:[%s5055_s4 + $0x1b0] sm:$0x7f] }
0x1c4c   :  { %2694 = vmax.xlane.f32.xlu1 %v2693_v1  ;;  %4245 = vmatprep.subr.msk.mxu1 %vm44_vm0, %v2945_v2 }
0x1c4d   :  { %v2690_v25 = vsel %vm234_vm2, %v2674_v23, -inf  ;;  %4246 = vmatpush3.msk.msra.mxu1 %vm44_vm0, %v2945_v2 }
0x1c4e   :  { %2691 = vmax.xlane.f32.xlu0 %v2690_v25 }
0x1c5d   :  { %2724 = vrot.lane.b32.xlu1 %v2571_v7, %s4431_s11 }
0x1c64   :  { %2726 = vrot.lane.b32.xlu0 %v2576_v41, %s4431_s11 }
0x1cd5   :  { %v2695_v29 = vpop.xlane.xlu1 %2694 }
0x1cd6   :  { %v2697_v31 = vmax.f32 %v2695_v29, %v2689_v28 }
0x1cd7   :  { %v2692_v10 = vpop.xlane.xlu0 %2691 }
0x1cd8   :  { %v2699_v9 = vsub.f32 %v2675_v61, %v2697_v31  ;;  %v2705_v32 = vsub.f32 %v2689_v28, %v2697_v31  ;;  %v2696_v33 = vmax.f32 %v2692_v10, %v2688_v30  ;;  %v3942_v10 = vld [vmem:[%s5055_s4 + $0x1f0] ss:$0 sm:$0xff] }
0x1cd9   :  { %v2725_v40 = vpop.permute.xlu1 %2724 }
0x1cda   :  { %v2702_v34 = vmul.f32 1.442695, %v2699_v9  ;;  %v2698_v35 = vsub.f32 %v2674_v23, %v2696_v33  ;;  %v2704_v36 = vsub.f32 %v2688_v30, %v2696_v33  ;;  %v2708_v45 = vmul.f32 1.442695, %v2705_v32  ;;  %v4405_v23 = vld [vmem:[%s5052_s1 + $0x8] sm:$0x3] }
0x1cdb   :  { %v2727_v37 = vpop.permute.xlu0 %2726 }
0x1cdc   :  { %4366 = vpow2.f32 %v2702_v34  ;;  %v2700_v38 = vmul.f32 1.442695, %v2698_v35  ;;  %4233 = vmatprep.subr.mxu0 %v2727_v37  ;;  %v2706_v24 = vmul.f32 1.442695, %v2704_v36  ;;  %v3943_v35 = vld [vmem:[%s5055_s4 + $0x1f8] ss:$0 sm:$0xff] }
0x1cdd   :  { %4234 = vmatpush3.msra.mxu0 %v2727_v37 }
0x1cde   :  { %4368 = vpow2.f32 %v2700_v38  ;;  %4235 = vmatprep.subr.mxu0 %v2725_v40 }
0x1cdf   :  { %4236 = vmatpush3.msra.mxu0 %v2725_v40  ;;  %4370 = vpow2.f32 %v2706_v24  ;;  %v3948_v40 = vld [vmem:[%s5055_s4 + $0x1c8] ss:$0 sm:$0xff] }
0x1ce0   :  { %4240 = vmatprep.subr.msk.mxu0 %vm44_vm0, %v2581_v19  ;;  %4372 = vpow2.f32 %v2708_v45  ;;  %v3956_v45 = vld [vmem:[%s5055_s4 + $0x1d0] ss:$0 sm:$0xff] }
0x1ce9   :  { %v4367_v16 = vpop.eup %4366 }
0x1cea   :  { %v2713_v42 = vsel %vm234_vm2, %v4367_v16, 0.0 }
0x1ceb   :  { %v4369_v43 = vpop.eup %4368  ;;  %2714 = vadd.xlane.f32.xlu0 %v2713_v42 }
0x1cec   :  { %4237 = vmatprep.mubr.msk.f32.mxu0 %vm234_vm2, %v4369_v43  ;;  %v2710_v44 = vsel %vm234_vm2, %v4369_v43, 0.0  ;;  %v4371_v50 = vpop.eup %4370 }
0x1ced   :  { %2711 = vadd.xlane.f32.xlu1 %v2710_v44  ;;  %4238 = vmatmul.mubr.msk.f32.vlgmr.msra.gmra.mxu0 %vm234_vm2, %v4367_v16  ;;  %v4373_v51 = vpop.eup %4372  ;;  %v2722_v57 = vmul.f32 %v4371_v50, %v3935_v54 }
0x1cee   :  { %4241 = vmatpush3.msk.msra.mxu0 %vm44_vm0, %v2581_v19  ;;  %v2723_v55 = vmul.f32 %v4373_v51, %v3935_v54  ;;  %v3944_v19 = vld [vmem:[%s5055_s4 + $0x1b8] ss:$0 sm:$0xff] }
0x1d74   :  { %v2715_v49 = vpop.xlane.xlu0 %2714 }
0x1d75   :  { %v2717_v53 = vadd.f32 %v4373_v51, %v2715_v49 }
0x1d76   :  { %v2712_v48 = vpop.xlane.xlu1 %2711 }
0x1d77   :  { %v2716_v52 = vadd.f32 %v4371_v50, %v2712_v48 }
0x1d79   :  { %4374 = vrcp.f32 %v2716_v52 }
0x1d7a   :  { %4376 = vrcp.f32 %v2717_v53 }
0x1d86   :  { %v4375_v63 = vpop.eup %4374 }
0x1d87   :  { %v4377_v0 = vpop.eup %4376 }
0x1dad   :  { %v4239_v56 = vpop.f32.mrf.mxu0 }
0x1dae   :  { %v2808_v59 = vadd.f32 %v4239_v56, %v2723_v55 }
0x1daf   :  { %v2802_v60 = vpop.f32.mrf.mxu0 }
0x1db0   :  { %v2803_v62 = vadd.f32 %v2802_v60, %v2722_v57  ;;  %v2814_v4 = vmul.f32 %v4377_v0, %v2808_v59  ;;  %v4406_v60 = vld [vmem:[%s5054_s3 + $0x8] sm:$0xff]  ;;  %v4407_v0 = vld [vmem:[%s5054_s3] sm:$0xff] }
0x1db2   :  { %v2813_v3 = vmul.f32 %v4375_v63, %v2803_v62 }
0x1db4   :  { %4242 = vmatprep.mubr.msk.f32.mxu0 %vm37_vm1, %v2813_v3 }
0x1db5   :  { %4243 = vmatmul.mubr.msk.f32.vlgmr.msra.gmra.mxu0 %vm37_vm1, %v2814_v4 }
0x1db6   :  { %4252 = vmatprep.mubr.msk.f32.mxu0 %vm587_vm4, %v4404_v47 }
0x1e75   :  { %v4244_v41 = vpop.f32.mrf.mxu0 }
0x1e76   :  { %v2900_v39 = vadd.f32 %v4244_v41, %v3938_v46 }
0x1e77   :  { %v2894_v7 = vpop.f32.mrf.mxu0 }
0x1e78   :  { %v2895_v8 = vadd.f32 %v3938_v46, %v2894_v7  ;;  %v2904_v11 = vadd.f32 %v2900_v39, %v4853_v6 }
0x1e7a   :  { %v2910_v12 = vsel %vm37_vm1, %v2904_v11, 0.0  ;;  %v2903_v13 = vadd.f32 %v2895_v8, %v4851_v5  ;;  %v3035_v5 = vld [vmem:[%s5055_s4 + $0x1c0] sm:$0x3f] }
0x1e7b   :  { %2911 = vadd.xlane.f32.xlu1 %v2910_v12  ;;  %4250 = vmatprep.subr.msk.mxu0 %vm594_vm3, %v3035_v5 }
0x1e7c   :  { %v2907_v14 = vsel %vm37_vm1, %v2903_v13, 0.0  ;;  %4251 = vmatpush3.msk.msra.mxu0 %vm594_vm3, %v3035_v5  ;;  %v3121_v5 = vld [vmem:[%s5055_s4 + $0x1e0] sm:$0x7f] }
0x1e7d   :  { %2908 = vadd.xlane.f32.xlu0 %v2907_v14  ;;  %4253 = vmatmul.mubr.msk.f32.vlgmr.msra.gmra.mxu0 %vm587_vm4, %v4405_v23 }
0x1f04   :  { %v2912_v15 = vpop.xlane.xlu1 %2911 }
0x1f05   :  { %v2914_v17 = vmul.f32 0.14285715, %v2912_v15 }
0x1f06   :  { %v2909_v18 = vpop.xlane.xlu0 %2908 }
0x1f07   :  { %v2916_v58 = vsub.f32 %v2904_v11, %v2914_v17  ;;  %v2913_v20 = vmul.f32 0.14285715, %v2909_v18 }
0x1f09   :  { %v2915_v21 = vsub.f32 %v2903_v13, %v2913_v20  ;;  %v2918_v22 = vmul.f32 %v2916_v58, %v2916_v58 }
0x1f0b   :  { %v2922_v61 = vsel %vm37_vm1, %v2918_v22, 0.0  ;;  %v2917_v1 = vmul.f32 %v2915_v21, %v2915_v21 }
0x1f0c   :  { %2923 = vadd.xlane.f32.xlu1 %v2922_v61 }
0x1f0d   :  { %v2919_v6 = vsel %vm37_vm1, %v2917_v1, 0.0 }
0x1f0e   :  { %2920 = vadd.xlane.f32.xlu0 %v2919_v6 }
0x1f3d   :  { %v4254_v16 = vpop.f32.mrf.mxu0 }
0x1f3e   :  { %v3116_v42 = vadd.f32 %v4254_v16, %v3948_v40 }
0x1f3f   :  { %v3110_v43 = vpop.f32.mrf.mxu0 }
0x1f40   :  { %4255 = vmatprep.subr.msk.mxu1 %vm37_vm1, %v3116_v42  ;;  %v3111_v44 = vadd.f32 %v3948_v40, %v3110_v43  ;;  %v3961_v43 = vld [vmem:[%s5055_s4 + $0x1e8] ss:$0 sm:$0xff] }
0x1f95   :  { %v2924_v25 = vpop.xlane.xlu1 %2923 }
0x1f96   :  { %v2926_v26 = vmul.f32 0.14285715, %v2924_v25 }
0x1f97   :  { %v2921_v27 = vpop.xlane.xlu0 %2920 }
0x1f98   :  { %v2928_v28 = vadd.f32 1e-05, %v2926_v26  ;;  %v2925_v29 = vmul.f32 0.14285715, %v2921_v27 }
0x1f9a   :  { %4378 = vrsqrt.f32 %v2928_v28  ;;  %v2927_v30 = vadd.f32 1e-05, %v2925_v29 }
0x1f9c   :  { %4380 = vrsqrt.f32 %v2927_v30 }
0x1fa7   :  { %v4379_v31 = vpop.eup %4378 }
0x1fa8   :  { %v2932_v9 = vmul.f32 %v4379_v31, %v2916_v58  ;;  %v3957_v31 = vld [vmem:[%s5055_s4 + $0x1d8] ss:$0 sm:$0xff] }
0x1fa9   :  { %v4381_v32 = vpop.eup %4380 }
0x1faa   :  { %v2931_v33 = vmul.f32 %v4381_v32, %v2915_v21  ;;  %v2938_v34 = vmul.f32 %v3942_v10, %v2932_v9 }
0x1fac   :  { %v2937_v36 = vmul.f32 %v3942_v10, %v2931_v33  ;;  %v4934_v38 = vadd.f32 %v3943_v35, %v2938_v34 }
0x1fae   :  { %v4932_v37 = vadd.f32 %v3943_v35, %v2937_v36 }
0x1fb0   :  { %4247 = vmatprep.mubr.msk.f32.mxu1 %vm37_vm1, %v4932_v37 }
0x1fb1   :  { %4248 = vmatmul.mubr.msk.f32.vlgmr.msra.gmra.mxu1 %vm37_vm1, %v4934_v38 }
0x1fb2   :  { %4256 = vmatpush3.xpose.msk.msra.mxu1 %vm37_vm1, %v3116_v42 }
0x1fb3   :  { %4257 = vmatprep.subr.msk.mxu1 %vm37_vm1, %v3111_v44 }
0x1fb6   :  { %4258 = vmatpush3.xpose.msk.msra.mxu1 %vm37_vm1, %v3111_v44 }
0x2071   :  { %v4249_v24 = vpop.f32.mrf.mxu1 }
0x2072   :  { %v3032_v48 = vadd.f32 %v4249_v24, %v3944_v19 }
0x2073   :  { %v3026_v49 = vpop.f32.mrf.mxu1 }
0x2074   :  { %v3027_v50 = vadd.f32 %v3944_v19, %v3026_v49  ;;  %v3219_v51 = vmul.f32 %v3956_v45, %v3032_v48 }
0x2076   :  { %4259 = vmatprep.mubr.msk.f32.mxu1 %vm37_vm1, %v3027_v50  ;;  %v3223_v52 = vsel %vm37_vm1, %v3219_v51, 0.0  ;;  %v3218_v53 = vmul.f32 %v3956_v45, %v3027_v50 }
0x2077   :  { %3224 = vadd.xlane.f32.xlu1 %v3223_v52  ;;  %4260 = vmatmul.mubr.msk.f32.vlgmr.msra.gmra.mxu1 %vm37_vm1, %v3032_v48 }
0x2078   :  { %v3220_v54 = vsel %vm37_vm1, %v3218_v53, 0.0 }
0x2079   :  { %3221 = vadd.xlane.f32.xlu0 %v3220_v54 }
0x2100   :  { %v3225_v47 = vpop.xlane.xlu1 %3224 }
0x2101   :  { %v3227_v41 = vmul.f32 0.37796447, %v3225_v47 }
0x2102   :  { %v3222_v46 = vpop.xlane.xlu0 %3221 }
0x2103   :  { %v3226_v7 = vmul.f32 0.37796447, %v3222_v46 }
0x2137   :  { %v4261_v55 = vpop.f32.mrf.mxu1 }
0x2138   :  { %v3211_v56 = vmul.f32 0.37796447, %v4261_v55 }
0x2139   :  { %v3201_v57 = vpop.f32.mrf.mxu1 }
0x213a   :  { %v3210_v59 = vmul.f32 0.37796447, %v3201_v57  ;;  %v3213_v62 = vadd.f32 %v4406_v60, %v3211_v56 }
0x213c   :  { %v3231_v63 = vsel %vm782_vm5, %v3213_v62, -inf  ;;  %v3212_v3 = vadd.f32 %v4407_v0, %v3210_v59 }
0x213d   :  { %3232 = vmax.xlane.f32.xlu1 %v3231_v63 }
0x213e   :  { %v3228_v4 = vsel %vm782_vm5, %v3212_v3, -inf }
0x213f   :  { %3229 = vmax.xlane.f32.xlu0 %v3228_v4 }
0x214e   :  { %3262 = vrot.lane.b32.xlu1 %v3111_v44, %s4430_s0 }
0x2155   :  { %3264 = vrot.lane.b32.xlu0 %v3116_v42, %s4430_s0 }
0x21c6   :  { %v3233_v39 = vpop.xlane.xlu1 %3232 }
0x21c7   :  { %v3235_v8 = vmax.f32 %v3233_v39, %v3227_v41  ;;  %v3965_v39 = vld [vmem:[%s5055_s4 + $0x200] ss:$0 sm:$0xff] }
0x21c8   :  { %v3230_v11 = vpop.xlane.xlu0 %3229 }
0x21c9   :  { %v3237_v12 = vsub.f32 %v3213_v62, %v3235_v8  ;;  %v3243_v13 = vsub.f32 %v3227_v41, %v3235_v8  ;;  %v3234_v14 = vmax.f32 %v3230_v11, %v3226_v7 }
0x21ca   :  { %v3263_v21 = vpop.permute.xlu1 %3262 }
0x21cb   :  { %v3240_v15 = vmul.f32 1.442695, %v3237_v12  ;;  %v3236_v17 = vsub.f32 %v3212_v3, %v3234_v14  ;;  %v3242_v18 = vsub.f32 %v3226_v7, %v3234_v14  ;;  %v3246_v23 = vmul.f32 1.442695, %v3243_v13  ;;  %v3966_v13 = vld [vmem:[%s5055_s4 + $0x208] ss:$0 sm:$0xff] }
0x21cc   :  { %v3265_v58 = vpop.permute.xlu0 %3264 }
0x21cd   :  { %4382 = vpow2.f32 %v3240_v15  ;;  %v3238_v20 = vmul.f32 1.442695, %v3236_v17  ;;  %4262 = vmatprep.subr.msk.mxu0 %vm828_vm6, %v3265_v58  ;;  %v3244_v2 = vmul.f32 1.442695, %v3242_v18  ;;  %v3576_v18 = vld [vmem:[%s5055_s4 + $0x230] sm:$0x7] }
0x21ce   :  { %4263 = vmatpush3.msk.msra.mxu0 %vm828_vm6, %v3265_v58  ;;  %v3967_v58 = vld [vmem:[%s5055_s4 + $0x228] ss:$0 sm:$0xff] }
0x21cf   :  { %4384 = vpow2.f32 %v3238_v20  ;;  %4264 = vmatprep.subr.mxu0 %v3263_v21 }
0x21d0   :  { %4265 = vmatpush3.msra.mxu0 %v3263_v21  ;;  %4386 = vpow2.f32 %v3244_v2 }
0x21d1   :  { %4269 = vmatprep.subr.msk.mxu0 %vm44_vm0, %v3121_v5  ;;  %4388 = vpow2.f32 %v3246_v23 }
0x21da   :  { %v4383_v22 = vpop.eup %4382 }
0x21db   :  { %v3251_v61 = vsel %vm782_vm5, %v4383_v22, 0.0 }
0x21dc   :  { %v4385_v1 = vpop.eup %4384  ;;  %3252 = vadd.xlane.f32.xlu0 %v3251_v61 }
0x21dd   :  { %4266 = vmatprep.mubr.msk.f32.mxu0 %vm782_vm5, %v4385_v1  ;;  %v3248_v6 = vsel %vm782_vm5, %v4385_v1, 0.0  ;;  %v4387_v27 = vpop.eup %4386 }
0x21de   :  { %3249 = vadd.xlane.f32.xlu1 %v3248_v6  ;;  %4267 = vmatmul.mubr.msk.f32.vlgmr.msra.gmra.mxu0 %vm782_vm5, %v4383_v22  ;;  %v4389_v28 = vpop.eup %4388  ;;  %v3260_v32 = vmul.f32 %v4387_v27, %v3957_v31 }
0x21df   :  { %4270 = vmatpush3.msk.msra.mxu0 %vm44_vm0, %v3121_v5  ;;  %v3261_v10 = vmul.f32 %v4389_v28, %v3957_v31  ;;  %v3971_v5 = vld [vmem:[%s5055_s4 + $0x238] ss:$0 sm:$0xff] }
0x21e0   :  { %4279 = vmatprep.subr.msk.mxu0 %vm1145_vm7, %v3576_v18 }
0x2265   :  { %v3253_v26 = vpop.xlane.xlu0 %3252 }
0x2266   :  { %v3255_v30 = vadd.f32 %v4389_v28, %v3253_v26 }
0x2267   :  { %v3250_v25 = vpop.xlane.xlu1 %3249 }
0x2268   :  { %v3254_v29 = vadd.f32 %v4387_v27, %v3250_v25 }
0x226a   :  { %4390 = vrcp.f32 %v3254_v29 }
0x226b   :  { %4392 = vrcp.f32 %v3255_v30 }
0x2277   :  { %v4391_v36 = vpop.eup %4390 }
0x2278   :  { %v4393_v40 = vpop.eup %4392 }
0x229e   :  { %v4268_v9 = vpop.f32.mrf.mxu0 }
0x229f   :  { %v3347_v33 = vadd.f32 %v4268_v9, %v3261_v10 }
0x22a0   :  { %v3341_v34 = vpop.f32.mrf.mxu0 }
0x22a1   :  { %v3342_v35 = vadd.f32 %v3341_v34, %v3260_v32  ;;  %v3353_v42 = vmul.f32 %v4393_v40, %v3347_v33 }
0x22a3   :  { %v3352_v16 = vmul.f32 %v4391_v36, %v3342_v35 }
0x22a5   :  { %4271 = vmatprep.mubr.msk.f32.mxu0 %vm37_vm1, %v3352_v16 }
0x22a6   :  { %4272 = vmatmul.mubr.msk.f32.vlgmr.msra.gmra.mxu0 %vm37_vm1, %v3353_v42 }
0x22a7   :  { %4280 = vmatpush3.msk.msra.mxu0 %vm1145_vm7, %v3576_v18 }
0x2366   :  { %v4273_v44 = vpop.f32.mrf.mxu0 }
0x2367   :  { %v3439_v19 = vadd.f32 %v4273_v44, %v3961_v43  ;;  %v3712_v44 = vld [vmem:[%s5055_s4 + $0x240] sm:$0x7f] }
0x2368   :  { %v3433_v24 = vpop.f32.mrf.mxu0 }
0x2369   :  { %v3434_v45 = vadd.f32 %v3961_v43, %v3433_v24  ;;  %v3443_v48 = vadd.f32 %v3439_v19, %v4934_v38 }
0x236b   :  { %v3449_v49 = vsel %vm37_vm1, %v3443_v48, 0.0  ;;  %v3442_v50 = vadd.f32 %v3434_v45, %v4932_v37  ;;  %v3484_v37 = vld [vmem:[%s5055_s4 + $0x220] sm:$0x7f] }
0x236c   :  { %3450 = vadd.xlane.f32.xlu1 %v3449_v49  ;;  %4274 = vmatprep.subr.msk.mxu1 %vm44_vm0, %v3484_v37 }
0x236d   :  { %v3446_v51 = vsel %vm37_vm1, %v3442_v50, 0.0  ;;  %4275 = vmatpush3.msk.msra.mxu1 %vm44_vm0, %v3484_v37 }
0x236e   :  { %3447 = vadd.xlane.f32.xlu0 %v3446_v51  ;;  %4284 = vmatprep.subr.msk.mxu1 %vm44_vm0, %v3712_v44 }
0x23f5   :  { %v3451_v52 = vpop.xlane.xlu1 %3450 }
0x23f6   :  { %v3453_v53 = vmul.f32 0.14285715, %v3451_v52  ;;  %v3975_v52 = vld [vmem:[%s5055_s4 + $0x210] ss:$0 sm:$0xff] }
0x23f7   :  { %v3448_v54 = vpop.xlane.xlu0 %3447 }
0x23f8   :  { %v3455_v55 = vsub.f32 %v3443_v48, %v3453_v53  ;;  %v3452_v56 = vmul.f32 0.14285715, %v3448_v54 }
0x23fa   :  { %v3454_v57 = vsub.f32 %v3442_v50, %v3452_v56  ;;  %v3457_v59 = vmul.f32 %v3455_v55, %v3455_v55 }
0x23fc   :  { %v3461_v60 = vsel %vm37_vm1, %v3457_v59, 0.0  ;;  %v3456_v62 = vmul.f32 %v3454_v57, %v3454_v57 }
0x23fd   :  { %3462 = vadd.xlane.f32.xlu1 %v3461_v60 }
0x23fe   :  { %v3458_v38 = vsel %vm37_vm1, %v3456_v62, 0.0 }
0x23ff   :  { %3459 = vadd.xlane.f32.xlu0 %v3458_v38  ;;  %v3977_v38 = vld [vmem:[%s5055_s4 + $0x248] ss:$0 sm:$0xff] }
0x2486   :  { %v3463_v63 = vpop.xlane.xlu1 %3462 }
0x2487   :  { %v3465_v0 = vmul.f32 0.14285715, %v3463_v63 }
0x2488   :  { %v3460_v3 = vpop.xlane.xlu0 %3459 }
0x2489   :  { %v3467_v4 = vadd.f32 1e-05, %v3465_v0  ;;  %v3464_v47 = vmul.f32 0.14285715, %v3460_v3 }
0x248b   :  { %4394 = vrsqrt.f32 %v3467_v4  ;;  %v3466_v46 = vadd.f32 1e-05, %v3464_v47 }
0x248d   :  { %4396 = vrsqrt.f32 %v3466_v46 }
0x2498   :  { %v4395_v41 = vpop.eup %4394 }
0x2499   :  { %v3471_v7 = vmul.f32 %v4395_v41, %v3455_v55  ;;  %v3976_v55 = vld [vmem:[%s5055_s4 + $0x218] ss:$0 sm:$0xff] }
0x249a   :  { %v4397_v8 = vpop.eup %4396 }
0x249b   :  { %v3470_v11 = vmul.f32 %v4397_v8, %v3454_v57  ;;  %v3477_v12 = vmul.f32 %v3965_v39, %v3471_v7 }
0x249d   :  { %v3476_v14 = vmul.f32 %v3965_v39, %v3470_v11  ;;  %v3483_v17 = vadd.f32 %v3966_v13, %v3477_v12 }
0x249f   :  { %v3482_v15 = vadd.f32 %v3966_v13, %v3476_v14 }
0x24a1   :  { %4276 = vmatprep.mubr.msk.f32.mxu1 %vm37_vm1, %v3482_v15 }
0x24a2   :  { %4277 = vmatmul.mubr.msk.f32.vlgmr.msra.gmra.mxu1 %vm37_vm1, %v3483_v17 }
0x24a3   :  { %4285 = vmatpush3.msk.msra.mxu1 %vm44_vm0, %v3712_v44 }
0x2562   :  { %v4278_v20 = vpop.f32.mrf.mxu1 }
0x2563   :  { %v3571_v21 = vadd.f32 %v4278_v20, %v3967_v58 }
0x2564   :  { %v3565_v22 = vpop.f32.mrf.mxu1 }
0x2565   :  { %v3566_v61 = vadd.f32 %v3967_v58, %v3565_v22  ;;  %v3575_v6 = vmax.f32 %v3571_v21, 0.0 }
0x2567   :  { %v3574_v1 = vmax.f32 %v3566_v61, 0.0 }
0x2569   :  { %4281 = vmatprep.mubr.msk.f32.mxu0 %vm1138_vm8, %v3574_v1 }
0x256a   :  { %4282 = vmatmul.mubr.msk.f32.vlgmr.msra.gmra.mxu0 %vm1138_vm8, %v3575_v6 }
0x262a   :  { %v4283_v2 = vpop.f32.mrf.mxu0 }
0x262b   :  { %v3663_v23 = vadd.f32 %v4283_v2, %v3971_v5 }
0x262c   :  { %v3657_v25 = vpop.f32.mrf.mxu0 }
0x262d   :  { %v3667_v26 = vmax.f32 %v3663_v23, 0.0  ;;  %v3658_v27 = vadd.f32 %v3971_v5, %v3657_v25 }
0x262f   :  { %v3666_v28 = vmax.f32 %v3658_v27, 0.0  ;;  %v3669_v29 = vadd.f32 %v3667_v26, %v3483_v17 }
0x2631   :  { %v3675_v30 = vsel %vm37_vm1, %v3669_v29, 0.0  ;;  %v3668_v31 = vadd.f32 %v3666_v28, %v3482_v15 }
0x2632   :  { %3676 = vadd.xlane.f32.xlu1 %v3675_v30 }
0x2633   :  { %v3672_v10 = vsel %vm37_vm1, %v3668_v31, 0.0 }
0x2634   :  { %3673 = vadd.xlane.f32.xlu0 %v3672_v10 }
0x26bb   :  { %v3677_v9 = vpop.xlane.xlu1 %3676 }
0x26bc   :  { %v3679_v32 = vmul.f32 0.14285715, %v3677_v9 }
0x26bd   :  { %v3674_v33 = vpop.xlane.xlu0 %3673 }
0x26be   :  { %v3681_v34 = vsub.f32 %v3669_v29, %v3679_v32  ;;  %v3678_v35 = vmul.f32 0.14285715, %v3674_v33 }
0x26c0   :  { %v3680_v36 = vsub.f32 %v3668_v31, %v3678_v35  ;;  %v3683_v40 = vmul.f32 %v3681_v34, %v3681_v34 }
0x26c2   :  { %v3687_v16 = vsel %vm37_vm1, %v3683_v40, 0.0  ;;  %v3682_v42 = vmul.f32 %v3680_v36, %v3680_v36 }
0x26c3   :  { %3688 = vadd.xlane.f32.xlu1 %v3687_v16 }
0x26c4   :  { %v3684_v43 = vsel %vm37_vm1, %v3682_v42, 0.0 }
0x26c5   :  { %3685 = vadd.xlane.f32.xlu0 %v3684_v43 }
0x274c   :  { %v3689_v19 = vpop.xlane.xlu1 %3688 }
0x274d   :  { %v3691_v24 = vmul.f32 0.14285715, %v3689_v19 }
0x274e   :  { %v3686_v45 = vpop.xlane.xlu0 %3685 }
0x274f   :  { %v3693_v48 = vadd.f32 1e-05, %v3691_v24  ;;  %v3690_v49 = vmul.f32 0.14285715, %v3686_v45 }
0x2751   :  { %4398 = vrsqrt.f32 %v3693_v48  ;;  %v3692_v50 = vadd.f32 1e-05, %v3690_v49 }
0x2753   :  { %4400 = vrsqrt.f32 %v3692_v50 }
0x275e   :  { %v4399_v51 = vpop.eup %4398 }
0x275f   :  { %v3697_v53 = vmul.f32 %v4399_v51, %v3681_v34 }
0x2760   :  { %v4401_v54 = vpop.eup %4400 }
0x2761   :  { %v3696_v56 = vmul.f32 %v4401_v54, %v3680_v36  ;;  %v3703_v57 = vmul.f32 %v3975_v52, %v3697_v53 }
0x2763   :  { %v3702_v59 = vmul.f32 %v3975_v52, %v3696_v56  ;;  %v3709_v60 = vadd.f32 %v3976_v55, %v3703_v57 }
0x2765   :  { %v3708_v62 = vadd.f32 %v3976_v55, %v3702_v59  ;;  %3711 = vst.msk [vmem:[%s5056_s5 + $0x8] sm:$0xff] %vm37_vm1, %v3709_v60 }
0x2767   :  { %3710 = vst.msk [vmem:[%s5056_s5] sm:$0xff] %vm37_vm1, %v3708_v62  ;;  %4286 = vmatprep.mubr.msk.f32.mxu1 %vm37_vm1, %v3708_v62  ;;  %s4408_s5 = scalar_lea.vmem %s3812_s29, 256 }
0x2768   :  { %4287 = vmatmul.mubr.msk.f32.vlgmr.msra.gmra.mxu1 %vm37_vm1, %v3709_v60  ;;  %p4409_p0 = scmp.ne.s32.totalorder %s3812_s29, %s4408_s5  ;;  %p4414_p2 = scmp.lt.s32.totalorder %s4408_s5, %s4408_s5 }
0x276a   :  { %p4415_p3 = por %p4414_p2, %p4413_p1 }
0x276c   :  { %p4416_p4 = pnand %p4415_p3, %p4409_p0 }
0x2828   :  { %v4288_v37 = vpop.f32.mrf.mxu1 }
0x2829   :  { %v3799_v63 = vadd.f32 %v4288_v37, %v3977_v38 }
0x282a   :  { %v3793_v0 = vpop.f32.mrf.mxu1 }
0x282b   :  { %3803 = vst.msk [vmem:[#allocation2 + $0x8] sm:$0xff] %vm782_vm5, %v3799_v63  ;;  %v3794_v3 = vadd.f32 %v3977_v38, %v3793_v0 }
0x282d   :  { %3802 = vst.msk [vmem:[#allocation2] sm:$0xff] %vm782_vm5, %v3794_v3 }
0x282e   :  { %4419 = shalt.err (!%p4416_p4)
}
0x282f   :  { %s4433_s30 = smov 128   ;;  %s4434_s4 = smov 8  }
0x2830   :  { %3817 = dma.vmem_to_hbm [thread:$0]  %s3812_s29, 256, %s5057_s6, [#allocation3], %s4433_s30, %s4433_s30, %s4434_s4  }
0x2831   :  { %4428 = dma.done.wait [#allocation3], 256  }
0x2832   :  { %4429 = vsyncadd [#allocation3], 4294967040 }
0x2833   :  { %3823 = vsyncpa [#allocation3], 1 }

</bundles_post_ra>
